<compile_context>
chip_gen: v7x
topology: tpu7x:2x2x1
jax: 0.10.0
libtpu: 0.0.40
codegen_flags: <defaults>
</compile_context>

<pallas_src>
import math

import numpy as np
import jax
import jax.numpy as jnp
from jax.experimental import pallas as pl
from jax.experimental.pallas import tpu as pltpu


# ----------------------------------------------------------------------------
# Host-side window / band-matrix construction
# ----------------------------------------------------------------------------
def _gaussian_1d(window_size, sigma=1.5):
    # Same normalized 1-D Gaussian as gaussian() in the PyTorch module.
    g = np.array(
        [math.exp(-((x - window_size // 2) ** 2) / (2.0 * sigma ** 2))
         for x in range(window_size)],
        dtype=np.float64,
    )
    g = g / g.sum()
    return g.astype(np.float32)


def _band_matrix_1d(g1d, n, pad_lo):
    # (n, n) banded matrix B with B[k, j] = g[k - j + pad_lo]; (rows, n) @ B
    # performs a 'same'-zero-padded 1-D correlation along the last axis, with
    # the boundary truncation folded into the band.
    ws = g1d.shape[0]
    B = np.zeros((n, n), dtype=np.float32)
    for j in range(n):              # output index
        for dx in range(ws):
            k = j + dx - pad_lo     # input index
            if 0 <= k < n:
                B[k, j] = g1d[dx]
    return B


def _band_matrix_2d(g1d, H, W, pad_lo):
    # (H*W, H*W) band for the full separable 2-D conv on flattened images:
    #   kron(BV, BH)[hi*W + wi, ho*W + wo] = gv[hi-ho+pad] * gh[wi-wo+pad]
    BV = _band_matrix_1d(g1d, H, pad_lo)
    BH = _band_matrix_1d(g1d, W, pad_lo)
    return np.kron(BV, BH).astype(np.float32)


# ----------------------------------------------------------------------------
# Shared epilogue
# ----------------------------------------------------------------------------
def _ssim_map(mu1, mu2, s11, s22, s12, C1, C2):
    mu1_sq = mu1 * mu1
    mu2_sq = mu2 * mu2
    mu1_mu2 = mu1 * mu2
    sigma1_sq = s11 - mu1_sq
    sigma2_sq = s22 - mu2_sq
    sigma12 = s12 - mu1_mu2
    v1 = 2.0 * sigma12 + C2
    v2 = sigma1_sq + sigma2_sq + C2
    num = (2.0 * mu1_mu2 + C1) * v1
    den = (mu1_sq + mu2_sq + C1) * v2
    # Reciprocal goes to the EUP slot (off the VALU critical path).
    # approx=True (~2^-12 rel err) is borderline vs the 2e-4 tolerance.
    return num * pl.reciprocal(den, approx=False)


# ----------------------------------------------------------------------------
# Small-image kernel: lane-dense flattened layout + one fused 2-D band matmul
# ----------------------------------------------------------------------------
def _make_ssim_kernel_flat(C, HW, C1, C2):
    inv_C = 1.0 / C

    def kernel(band_ref, x1_ref, x2_ref, o_ref, stk_ref):
        x1 = x1_ref[0].astype(jnp.float32)          # (C, HW), lane-dense
        x2 = x2_ref[0].astype(jnp.float32)

        # Stack the five conv operands -> ONE fused MXU matmul.
        stk_ref[0 * C:1 * C] = x1
        stk_ref[1 * C:2 * C] = x2
        stk_ref[2 * C:3 * C] = x1 * x1
        stk_ref[3 * C:4 * C] = x2 * x2
        stk_ref[4 * C:5 * C] = x1 * x2

        conv = jnp.dot(stk_ref[...], band_ref[...],
                       preferred_element_type=jnp.float32,
                       precision=jax.lax.Precision.HIGHEST)  # (5C, HW)

        mu1 = conv[0 * C:1 * C]
        mu2 = conv[1 * C:2 * C]
        s11 = conv[2 * C:3 * C]
        s22 = conv[3 * C:4 * C]
        s12 = conv[4 * C:5 * C]

        ssim = _ssim_map(mu1, mu2, s11, s22, s12, C1, C2)
        # torch: ssim_map.mean(1) -> mean over channels only; lane-dense store.
        o_ref[0, 0] = jnp.sum(ssim, axis=0) * inv_C

    return kernel


# ----------------------------------------------------------------------------
# Large-image fallback kernel: separable conv, fused horizontal band matmul
# ----------------------------------------------------------------------------
def _make_ssim_kernel_separable(g1d, C, H, W, pad_lo, C1, C2):
    ws = int(g1d.shape[0])
    inv_C = 1.0 / C

    def kernel(bandw_ref, x1_ref, x2_ref, o_ref, acc_ref):
        x1 = x1_ref[0].astype(jnp.float32)          # (C, H, W)
        x2 = x2_ref[0].astype(jnp.float32)

        # Vertical (sublane-axis) 5-tap pass reading taps directly from the
        # inputs; boundary rows handled by the slice extents (zero 'same' pad).
        # The centre tap runs first and *initializes* the accumulator, so no
        # full-slab zero-init pass is needed.
        taps = [pad_lo] + [d for d in range(ws) if d != pad_lo]
        for idx, dy in enumerate(taps):
            s = dy - pad_lo
            lo = max(0, -s)
            hi = min(H, H - s)
            w = float(g1d[dy])
            a = x1[:, lo + s:hi + s, :]
            b = x2[:, lo + s:hi + s, :]
            vals = (w * a, w * b, w * (a * a), w * (b * b), w * (a * b))
            for slab, v in enumerate(vals):
                if idx == 0:
                    acc_ref[slab, :, lo:hi, :] = v
                else:
                    acc_ref[slab, :, lo:hi, :] += v

        # Horizontal (lane-axis) pass: ONE fused banded matmul for all five
        # accumulators: (5*C*H, W) @ (W, W).
        stacked = acc_ref[...].reshape(5 * C * H, W)
        conv = jnp.dot(stacked, bandw_ref[...],
                       preferred_element_type=jnp.float32,
                       precision=jax.lax.Precision.HIGHEST)
        conv = conv.reshape(5, C, H, W)

        ssim = _ssim_map(conv[0], conv[1], conv[2], conv[3], conv[4], C1, C2)
        o_ref[0] = jnp.sum(ssim, axis=0) * inv_C

    return kernel


# ----------------------------------------------------------------------------
# Wrapper
# ----------------------------------------------------------------------------
def ssim_pallas(img1, img2, window_size=5, val_range=1.0):
    N, C, H, W = img1.shape
    real_size = min(window_size, H, W)
    pad_lo = (real_size - 1) // 2
    g1d = _gaussian_1d(real_size, sigma=1.5)

    C1 = (0.01 * val_range) ** 2
    C2 = (0.03 * val_range) ** 2
    HW = H * W

    if HW <= 1024:
        # ---- lane-dense flattened small-image path -------------------------
        band2d = jnp.asarray(_band_matrix_2d(g1d, H, W, pad_lo))     # (HW, HW)
        x1f = img1.reshape(N, C, HW)
        x2f = img2.reshape(N, C, HW)
        kernel = _make_ssim_kernel_flat(C, HW, C1, C2)

        out = pl.pallas_call(
            kernel,
            out_shape=jax.ShapeDtypeStruct((N, 1, HW), jnp.float32),
            grid=(N,),
            in_specs=[
                pl.BlockSpec((HW, HW), lambda n: (0, 0)),        # 2-D conv band
                pl.BlockSpec((1, C, HW), lambda n: (n, 0, 0)),
                pl.BlockSpec((1, C, HW), lambda n: (n, 0, 0)),
            ],
            out_specs=pl.BlockSpec((1, 1, HW), lambda n: (n, 0, 0)),
            scratch_shapes=[pltpu.VMEM((5 * C, HW), jnp.float32)],
            compiler_params=pltpu.CompilerParams(
                dimension_semantics=("parallel",)),
        )(band2d, x1f, x2f)
        return out.reshape(N, H, W)

    # ---- separable whole-image fallback (larger images) --------------------
    # TODO(synk): H-tile with a (ws-1)-row halo for v7x (64 MiB VMEM) and to
    #             keep both v7x TensorCores busy when N is small/odd.
    bandw = jnp.asarray(_band_matrix_1d(g1d, W, pad_lo))             # (W, W)
    kernel = _make_ssim_kernel_separable(g1d, C, H, W, pad_lo, C1, C2)

    return pl.pallas_call(
        kernel,
        out_shape=jax.ShapeDtypeStruct((N, H, W), jnp.float32),
        grid=(N,),
        in_specs=[
            pl.BlockSpec((W, W), lambda n: (0, 0)),              # horiz band
            pl.BlockSpec((1, C, H, W), lambda n: (n, 0, 0, 0)),
            pl.BlockSpec((1, C, H, W), lambda n: (n, 0, 0, 0)),
        ],
        out_specs=pl.BlockSpec((1, H, W), lambda n: (n, 0, 0)),
        scratch_shapes=[pltpu.VMEM((5, C, H, W), jnp.float32)],
        compiler_params=pltpu.CompilerParams(
            dimension_semantics=("parallel",),
            vmem_limit_bytes=96 << 20),   # v6e/v5e: raise 32/16 MiB default
    )(bandw, img1, img2)


# ----------------------------------------------------------------------------
# Pure-numpy float64 reference mirroring the PyTorch ssim() forward
# ----------------------------------------------------------------------------
def _ssim_ref_np(img1, img2, window_size=5, val_range=1.0):
    img1 = np.asarray(img1, dtype=np.float64)
    img2 = np.asarray(img2, dtype=np.float64)
    N, C, H, W = img1.shape
    real_size = min(window_size, H, W)
    g = _gaussian_1d(real_size, sigma=1.5).astype(np.float64)
    w2d = np.outer(g, g)
    pad_lo = (real_size - 1) // 2
    pad_hi = real_size - 1 - pad_lo

    def conv(x):
        xp = np.pad(x, ((0, 0), (0, 0), (pad_lo, pad_hi), (pad_lo, pad_hi)))
        out = np.zeros((N, C, H, W), dtype=np.float64)
        for dy in range(real_size):
            for dx in range(real_size):
                out += w2d[dy, dx] * xp[:, :, dy:dy + H, dx:dx + W]
        return out

    mu1, mu2 = conv(img1), conv(img2)
    mu1_sq, mu2_sq, mu1_mu2 = mu1 ** 2, mu2 ** 2, mu1 * mu2
    sigma1_sq = conv(img1 * img1) - mu1_sq
    sigma2_sq = conv(img2 * img2) - mu2_sq
    sigma12 = conv(img1 * img2) - mu1_mu2
    C1 = (0.01 * val_range) ** 2
    C2 = (0.03 * val_range) ** 2
    v1 = 2.0 * sigma12 + C2
    v2 = sigma1_sq + sigma2_sq + C2
    ssim_map = (2.0 * mu1_mu2 + C1) * v1 / ((mu1_sq + mu2_sq + C1) * v2)
    return ssim_map.mean(axis=1)


if __name__ == "__main__":
    key = jax.random.PRNGKey(0)
    k1, k2, k3, k4 = jax.random.split(key, 4)

    # Module defaults: channel=3, window_size=5; images in [0, 1] (val_range=1).
    img1 = jax.random.uniform(k1, (2, 3, 16, 16), dtype=jnp.float32)
    img2 = jax.random.uniform(k2, (2, 3, 16, 16), dtype=jnp.float32)

    out = ssim_pallas(img1, img2, window_size=5, val_range=1.0)
    out = jax.block_until_ready(out)
    ref = _ssim_ref_np(np.asarray(img1), np.asarray(img2), 5, 1.0)
    np.testing.assert_allclose(np.asarray(out), ref, rtol=2e-4, atol=2e-4)

    # Small non-square sanity check (same lane-dense path).
    a = jax.random.uniform(k3, (1, 3, 12, 20), dtype=jnp.float32)
    b = jax.random.uniform(k4, (1, 3, 12, 20), dtype=jnp.float32)
    out2 = jax.block_until_ready(ssim_pallas(a, b, 5, 1.0))
    ref2 = _ssim_ref_np(np.asarray(a), np.asarray(b), 5, 1.0)
    np.testing.assert_allclose(np.asarray(out2), ref2, rtol=2e-4, atol=2e-4)

    print("KERNEL_OK")
</pallas_src>

<mosaic_0001>
module attributes {stable_mosaic.version = 11 : i64} {
  func.func @kernel(%arg0: i32, %arg1: memref<256x256xf32, #tpu.memory_space<vmem>>, %arg2: memref<1x3x256xf32, #tpu.memory_space<vmem>>, %arg3: memref<1x3x256xf32, #tpu.memory_space<vmem>>, %arg4: memref<1x1x256xf32, #tpu.memory_space<vmem>>, %arg5: memref<15x256xf32, #tpu.memory_space<vmem>>) attributes {dimension_semantics = [#tpu.dimension_semantics<parallel>], iteration_bounds = array<i64: 2>, scalar_prefetch = 0 : i64, scratch_operands = 1 : i64, tpu.core_type = #tpu.core_type<tc>, window_params = [{pipeline_mode = #tpu.pipeline_mode<synchronous>, transform_indices = @transform_0, window_bounds = array<i64: 256, 256>}, {transform_indices = @transform_1, window_bounds = array<i64: 1, 3, 256>}, {transform_indices = @transform_2, window_bounds = array<i64: 1, 3, 256>}, {transform_indices = @transform_3, window_bounds = array<i64: 1, 1, 256>}]} {
    %c0 = arith.constant 0 : index
    %c0_0 = arith.constant 0 : index
    %c0_1 = arith.constant 0 : index
    %0 = vector.load %arg2[%c0, %c0_0, %c0_1] : memref<1x3x256xf32, #tpu.memory_space<vmem>>, vector<1x3x256xf32>
    %1 = vector.shape_cast %0 : vector<1x3x256xf32> to vector<3x256xf32>
    %c0_2 = arith.constant 0 : index
    %c0_3 = arith.constant 0 : index
    %c0_4 = arith.constant 0 : index
    %2 = vector.load %arg3[%c0_2, %c0_3, %c0_4] : memref<1x3x256xf32, #tpu.memory_space<vmem>>, vector<1x3x256xf32>
    %3 = vector.shape_cast %2 : vector<1x3x256xf32> to vector<3x256xf32>
    %c0_5 = arith.constant 0 : index
    %c0_6 = arith.constant 0 : index
    %4 = vector.load %arg5[%c0_5, %c0_6] : memref<15x256xf32, #tpu.memory_space<vmem>>, vector<3x256xf32>
    tpu.vector_store %arg5[%c0_5, %c0_6], %1 {strides = array<i32>} : memref<15x256xf32, #tpu.memory_space<vmem>>, vector<3x256xf32>,
    %c3 = arith.constant 3 : index
    %c0_7 = arith.constant 0 : index
    %5 = vector.load %arg5[%c3, %c0_7] : memref<15x256xf32, #tpu.memory_space<vmem>>, vector<3x256xf32>
    tpu.vector_store %arg5[%c3, %c0_7], %3 {strides = array<i32>} : memref<15x256xf32, #tpu.memory_space<vmem>>, vector<3x256xf32>,
    %6 = arith.mulf %1, %1 : vector<3x256xf32>
    %c6 = arith.constant 6 : index
    %c0_8 = arith.constant 0 : index
    %7 = vector.load %arg5[%c6, %c0_8] : memref<15x256xf32, #tpu.memory_space<vmem>>, vector<3x256xf32>
    tpu.vector_store %arg5[%c6, %c0_8], %6 {strides = array<i32>} : memref<15x256xf32, #tpu.memory_space<vmem>>, vector<3x256xf32>,
    %8 = arith.mulf %3, %3 : vector<3x256xf32>
    %c9 = arith.constant 9 : index
    %c0_9 = arith.constant 0 : index
    %9 = vector.load %arg5[%c9, %c0_9] : memref<15x256xf32, #tpu.memory_space<vmem>>, vector<3x256xf32>
    tpu.vector_store %arg5[%c9, %c0_9], %8 {strides = array<i32>} : memref<15x256xf32, #tpu.memory_space<vmem>>, vector<3x256xf32>,
    %10 = arith.mulf %1, %3 : vector<3x256xf32>
    %c12 = arith.constant 12 : index
    %c0_10 = arith.constant 0 : index
    %11 = vector.load %arg5[%c12, %c0_10] : memref<15x256xf32, #tpu.memory_space<vmem>>, vector<3x256xf32>
    tpu.vector_store %arg5[%c12, %c0_10], %10 {strides = array<i32>} : memref<15x256xf32, #tpu.memory_space<vmem>>, vector<3x256xf32>,
    %c0_11 = arith.constant 0 : index
    %c0_12 = arith.constant 0 : index
    %12 = vector.load %arg5[%c0_11, %c0_12] : memref<15x256xf32, #tpu.memory_space<vmem>>, vector<15x256xf32>
    %c0_13 = arith.constant 0 : index
    %c0_14 = arith.constant 0 : index
    %13 = vector.load %arg1[%c0_13, %c0_14] : memref<256x256xf32, #tpu.memory_space<vmem>>, vector<256x256xf32>
    %cst = arith.constant dense<0.000000e+00> : vector<15x256xf32>
    %14 = tpu.matmul %12, %13, %cst {dimension_numbers = #tpu.dot_dimension_numbers<[1], [0], [0], [1], [0, 0, 1, 1], [], []>, precision = #tpu.contract_precision<fp32>} : vector<15x256xf32>, vector<256x256xf32>, vector<15x256xf32> -> vector<15x256xf32>
    %15 = vector.extract_strided_slice %14 {offsets = [0, 0], sizes = [3, 256], strides = [1, 1]} : vector<15x256xf32> to vector<3x256xf32>
    %16 = vector.extract_strided_slice %14 {offsets = [3, 0], sizes = [3, 256], strides = [1, 1]} : vector<15x256xf32> to vector<3x256xf32>
    %17 = vector.extract_strided_slice %14 {offsets = [6, 0], sizes = [3, 256], strides = [1, 1]} : vector<15x256xf32> to vector<3x256xf32>
    %18 = vector.extract_strided_slice %14 {offsets = [9, 0], sizes = [3, 256], strides = [1, 1]} : vector<15x256xf32> to vector<3x256xf32>
    %19 = vector.extract_strided_slice %14 {offsets = [12, 0], sizes = [3, 256], strides = [1, 1]} : vector<15x256xf32> to vector<3x256xf32>
    %20 = arith.mulf %15, %15 : vector<3x256xf32>
    %21 = arith.mulf %16, %16 : vector<3x256xf32>
    %22 = arith.mulf %15, %16 : vector<3x256xf32>
    %23 = arith.subf %17, %20 : vector<3x256xf32>
    %24 = arith.subf %18, %21 : vector<3x256xf32>
    %25 = arith.subf %19, %22 : vector<3x256xf32>
    %cst_15 = arith.constant 2.000000e+00 : f32
    %26 = vector.broadcast %cst_15 : f32 to vector<3x256xf32>
    %27 = arith.mulf %26, %25 : vector<3x256xf32>
    %cst_16 = arith.constant 8.99999984E-4 : f32
    %28 = vector.broadcast %cst_16 : f32 to vector<3x256xf32>
    %29 = arith.addf %27, %28 : vector<3x256xf32>
    %30 = arith.addf %23, %24 : vector<3x256xf32>
    %cst_17 = arith.constant 8.99999984E-4 : f32
    %31 = vector.broadcast %cst_17 : f32 to vector<3x256xf32>
    %32 = arith.addf %30, %31 : vector<3x256xf32>
    %cst_18 = arith.constant 2.000000e+00 : f32
    %33 = vector.broadcast %cst_18 : f32 to vector<3x256xf32>
    %34 = arith.mulf %33, %22 : vector<3x256xf32>
    %cst_19 = arith.constant 9.99999974E-5 : f32
    %35 = vector.broadcast %cst_19 : f32 to vector<3x256xf32>
    %36 = arith.addf %34, %35 : vector<3x256xf32>
    %37 = arith.mulf %36, %29 : vector<3x256xf32>
    %38 = arith.addf %20, %21 : vector<3x256xf32>
    %cst_20 = arith.constant 9.99999974E-5 : f32
    %39 = vector.broadcast %cst_20 : f32 to vector<3x256xf32>
    %40 = arith.addf %38, %39 : vector<3x256xf32>
    %41 = arith.mulf %40, %32 : vector<3x256xf32>
    %42 = tpu.reciprocal %41 : vector<3x256xf32> -> vector<3x256xf32>
    %43 = arith.mulf %37, %42 : vector<3x256xf32>
    %cst_21 = arith.constant dense<0.000000e+00> : vector<256xf32>
    %44 = vector.multi_reduction <add>, %43, %cst_21 [0] : vector<3x256xf32> to vector<256xf32>
    %cst_22 = arith.constant 0.333333343 : f32
    %45 = vector.broadcast %cst_22 : f32 to vector<256xf32>
    %46 = arith.mulf %44, %45 : vector<256xf32>
    %c0_23 = arith.constant 0 : index
    %c0_24 = arith.constant 0 : index
    %c0_25 = arith.constant 0 : index
    %47 = vector.load %arg4[%c0_23, %c0_24, %c0_25] : memref<1x1x256xf32, #tpu.memory_space<vmem>>, vector<1x1x256xf32>
    %48 = vector.shape_cast %47 : vector<1x1x256xf32> to vector<256xf32>
    %49 = vector.shape_cast %46 : vector<256xf32> to vector<1x1x256xf32>
    tpu.vector_store %arg4[%c0_23, %c0_24, %c0_25], %49 {strides = array<i32>} : memref<1x1x256xf32, #tpu.memory_space<vmem>>, vector<1x1x256xf32>,
    return
  }
  func.func @transform_0(%arg0: i32) -> (i32, i32) {
    %c0_i32 = arith.constant 0 : i32
    %c0_i32_0 = arith.constant 0 : i32
    %c0_i32_1 = arith.constant 0 : i32
    return %c0_i32, %c0_i32_0 : i32, i32
  }
  func.func @transform_1(%arg0: i32) -> (i32, i32, i32) {
    %c0_i32 = arith.constant 0 : i32
    %c0_i32_0 = arith.constant 0 : i32
    %c0_i32_1 = arith.constant 0 : i32
    return %arg0, %c0_i32, %c0_i32_0 : i32, i32, i32
  }
  func.func @transform_2(%arg0: i32) -> (i32, i32, i32) {
    %c0_i32 = arith.constant 0 : i32
    %c0_i32_0 = arith.constant 0 : i32
    %c0_i32_1 = arith.constant 0 : i32
    return %arg0, %c0_i32, %c0_i32_0 : i32, i32, i32
  }
  func.func @transform_3(%arg0: i32) -> (i32, i32, i32) {
    %c0_i32 = arith.constant 0 : i32
    %c0_i32_0 = arith.constant 0 : i32
    %c0_i32_1 = arith.constant 0 : i32
    return %arg0, %c0_i32, %c0_i32_0 : i32, i32, i32
  }
}

</mosaic_0001>

<bundles_post_ra>
// kernel: tpu_custom_call.1
= control target key start
LH: loop header
LB: loop body
LE: loop exit
PB: predicated region body
PF: predicated region fallthrough
CT: control target
= control target key end

     0   :  { %8 = vsyncpa [#allocation4], 0  ;;  %s3391_s0 = inlined_call_operand.hbm [shape: f32[256,256], index: 0, kind: input, shape index: {}]   ;;  %s3392_s1 = inlined_call_operand.vmem [shape: f32[2,3,256], index: 1, kind: input, shape index: {}]   ;;  %s3393_s2 = inlined_call_operand.vmem [shape: f32[2,3,256], index: 2, kind: input, shape index: {}]   ;;  %s3394_s3 = inlined_call_operand.hbm [shape: f32[2,1,256], index: 3, kind: output, shape index: {}]  }
   0x1   :  { %9 = vsyncpa [#allocation5], 0 }
   0x2   :  { %11 = vsyncpa [#allocation5 + $0x1], 0  ;;  %s2485_s12 = smov 0   ;;  %s2487_s13 = smov 0  }
   0x3   :  { %s2489_s14 = smov 0   ;;  %s2491_s15 = smov 0  }
   0x4 LB: > { %s2506_s16 = sadd.s32 4294967295, %s2458_s15   ;;  %s1882_s17 = sadd.s32 4294967294, %s2458_s15   ;;  %s2458_s15 = sphi %s2491_s15, %s3805_s15   ;;  %s2454_s14 = sphi %s2489_s14, %s3804_s14   ;;  %s2450_s13 = sphi %s2487_s13, %s3803_s13   ;;  %s2446_s12 = sphi %s2485_s12, %s3802_s12  }
   0x5   : > { %s2510_s18 = sadd.s32 1, %s2458_s15   ;;  %s97_s19 = sadd.s32 1, %s2454_s14 }
   0x6   : > { %s94_s20 = ssub.s32 %s2458_s15, %s2510_s18  ;;  %p107_p0 = scmp.ne.s32.totalorder %s2454_s14, %s2450_s13 }
   0x7   : > { %p95_p1 = scmp.eq.s32.totalorder %s94_s20, 0  ;;  %p108_p2 = scmp.eq.s32.totalorder %s2506_s16, 1 }
   0x8   : > { %p113_p3 = scmp.ne.s32.totalorder %s2450_s13, %s2446_s12  ;;  %p114_p4 = scmp.eq.s32.totalorder %s1882_s17, 1 }
   0x9   : > { %s2521_s21 = scalar_select %p95_p1, %s2454_s14, %s97_s19  }
   0xa   : > { %p2523_p5 = por %p108_p2, %p107_p0  ;;  %p2527_p6 = por %p114_p4, %p113_p3 }
   0xb   : > { %p1883_p7 = scmp.ge.s32.totalorder %s2458_s15, 1  ;;  %p121_p8 = scmp.lt.s32.totalorder %s2458_s15, 3 }
   0xc   : > { %s3540_s22 = scalar_select %p2523_p5, 1, 0 }
   0xd   : > { %s3541_s23 = scalar_select %p2527_p6, 1, 0 }
   0xe   : > { %p3395_p9 = scmp.eq.s32.totalorder %s2506_s16, 0  ;;  %p2534_p10 = pnand %p1883_p7, %p121_p8 }
   0xf   : > { %s2460_s25 = smov [#allocation3]   ;;  %s2364_s30 = scalar_lea.hbm %s3391_s0, 8192 }
  0x10   : > { %s3542_s24 = scalar_select %p2534_p10, 1, 0 }
  0x11   : > { %s133_s26 = sshll.u32 %s2460_s25, 4  ;;  %p2311_p11 = pneg %p2534_p10  ;;  %s134_s26 = int_to_ptr.vmem [resolvable:$true] %s133_s26 }
  0x12   : > { %p2365_p13 = scmp.ne.s32.totalorder %s3391_s0, %s2364_s30  ;;  %p2371_p3 = scmp.lt.u32.totalorder %s2364_s30, %s3391_s0 }
  0x13   : > { %p2542_p12 = pnand %p3395_p9, %p2311_p11 }
  0x15   : > { %p2366_p0 = pneg %p2542_p12 }
  0x17   : > { %p2367_p1 = pnand %p2366_p0, %p2365_p13 }
  0x19   : > { %p2368_p2 = pneg %p2367_p1 }
  0x1b   : > { %p2373_p4 = pnand %p2371_p3, %p2368_p2 }
  0x1d   : > { %2376 = shalt.err (!%p2373_p4)
}
  0x1e   : > { %s2377_s8 = scalar_lea.vmem %s134_s26, 8192  ;;  %p2385_p9 = scmp.lt.s32.totalorder %s134_s26, %s134_s26 }
  0x1f   : > { %p2378_p7 = scmp.ne.s32.totalorder %s134_s26, %s2377_s8  ;;  %p2386_p6 = scmp.lt.s32.totalorder %s2377_s8, %s2377_s8 }
  0x21   : > { %p2380_p8 = pnand %p2378_p7, %p2366_p0  ;;  %p2387_p5 = por %p2386_p6, %p2385_p9 }
  0x23   : > { %p2381_p11 = pneg %p2380_p8 }
  0x25   : > { %p2388_p10 = pnand %p2387_p5, %p2381_p11 }
  0x27   : > { %2391 = shalt.err (!%p2388_p10)
}
  0x28   : > { %s2461_s9 = smov 256   ;;  %s2462_s10 = smov 16  }
  0x29   : > { %2314 = dma.hbm_to_vmem [thread:$0]  (!%p2542_p12), %s3391_s0, 8192, %s134_s26, [#allocation4], %s2461_s9, %s2461_s9, %s2462_s10  }
  0x2a   : > { %p3544_p13 = scmp.ne.s32.totalorder %s3542_s24, 0 }
  0x2c   : > { %165 = sbr.rel (%p3544_p13) target bundleno = 533 (0x215), region = 32 }
  0x33   : > { %p3545_p1 = scmp.eq.s32.totalorder %s2506_s16, 0 }
  0x35   : > { %2437 = dma.done.wait (%p3545_p1), [#allocation4], 8192   ;;  %p3546_p0 = pmov %p3545_p1 }
  0x36   : > { %v250_v0 = vld [vmem:[#allocation3 + $0x8] sm:$0xff]  ;;  %v252_v1 = vld [vmem:[#allocation3 + $0x18] sm:$0xff]  ;;  %v249_v2 = vld [vmem:[#allocation3] sm:$0xff]  ;;  %p194_p5 = scmp.lt.s32.totalorder %s2506_s16, 1  ;;  %vm1729_vm0 = vcmask 1041408   ;;  %vm1744_vm1 = vcmask 1042432  }
  0x37   : > { %2439 = vsyncadd (%p3546_p0), [#allocation4], 4294959104  ;;  %v313_v3 = vand.u32 4294901760, %v250_v0  ;;  %v317_v4 = vand.u32 4294901760, %v252_v1  ;;  %v251_v5 = vld [vmem:[#allocation3 + $0x10] sm:$0xff]  ;;  %v315_v6 = vand.u32 4294901760, %v249_v2 }
  0x38   : > { %v254_v7 = vld [vmem:[#allocation3 + $0x28] sm:$0xff]  ;;  %v256_v8 = vld [vmem:[#allocation3 + $0x38] sm:$0xff]  ;;  %v319_v9 = vand.u32 4294901760, %v251_v5  ;;  %v253_v12 = vld [vmem:[#allocation3 + $0x20] sm:$0xff]  ;;  %s2620_s19 = scalar_select %p194_p5, %s2506_s16, 1 }
  0x39   : > { %v321_v10 = vand.u32 4294901760, %v254_v7  ;;  %v325_v11 = vand.u32 4294901760, %v256_v8  ;;  %v255_v13 = vld [vmem:[#allocation3 + $0x30] sm:$0xff]  ;;  %v258_v14 = vld [vmem:[#allocation3 + $0x48] sm:$0xff]  ;;  %v2568_v15 = vpack.c.bf16 %v317_v4, %v313_v3  ;;  %v260_v16 = vld [vmem:[#allocation3 + $0x58] sm:$0xff]  ;;  %v323_v23 = vand.u32 4294901760, %v253_v12 }
  0x3a   : > { %v257_v17 = vld [vmem:[#allocation3 + $0x40] sm:$0xff]  ;;  %v259_v18 = vld [vmem:[#allocation3 + $0x50] sm:$0xff]  ;;  %v2570_v19 = vpack.c.bf16 %v319_v9, %v315_v6  ;;  %v262_v21 = vld [vmem:[#allocation3 + $0x68] sm:$0xff]  ;;  %v327_v24 = vand.u32 4294901760, %v255_v13  ;;  %v329_v25 = vand.u32 4294901760, %v258_v14  ;;  %v333_v26 = vand.u32 4294901760, %v260_v16 }
  0x3b   : > { %3547 = vst [vmem:[#allocation9_spill] sm:$0xff] %v2568_v15  ;;  %v2572_v20 = vpack.c.bf16 %v325_v11, %v321_v10  ;;  %v264_v22 = vld [vmem:[#allocation3 + $0x78] sm:$0xff]  ;;  %1902 = vmatprep.subr.bf16.mxu1 %v2568_v15  ;;  %2094 = vmatprep.subr.bf16.mxu0 %v2568_v15  ;;  %v331_v27 = vand.u32 4294901760, %v257_v17  ;;  %v335_v28 = vand.u32 4294901760, %v259_v18  ;;  %v2578_v29 = vsub.f32 %v250_v0, %v313_v3  ;;  %v261_v33 = vld [vmem:[#allocation3 + $0x60] sm:$0xff]  ;;  %v263_v34 = vld [vmem:[#allocation3 + $0x70] sm:$0xff] }
  0x3c   : > { %3548 = vst [vmem:[#allocation10_spill] sm:$0xff] %v2570_v19  ;;  %1904 = vmatpush1.bf16.msra.mxu1 %v2570_v19  ;;  %2096 = vmatpush1.bf16.msra.mxu0 %v2570_v19  ;;  %v2582_v30 = vpack.c.bf16 %v327_v24, %v323_v23  ;;  %v337_v31 = vand.u32 4294901760, %v262_v21  ;;  %v341_v32 = vand.u32 4294901760, %v264_v22  ;;  %v2584_v35 = vsub.f32 %v252_v1, %v317_v4  ;;  %v266_v39 = vld [vmem:[#allocation3 + $0x88] sm:$0xff]  ;;  %v268_v40 = vld [vmem:[#allocation3 + $0x98] sm:$0xff]  ;;  %v265_v45 = vld [vmem:[#allocation3 + $0x80] sm:$0xff] }
  0x3d   : > { %3549 = vst [vmem:[#allocation11_spill] sm:$0xff] %v2572_v20  ;;  %3550 = vst [vmem:[#allocation12_spill] sm:$0xff] %v2578_v29  ;;  %1906 = vmatprep.subr.bf16.mxu1 %v2572_v20  ;;  %2098 = vmatprep.subr.bf16.mxu0 %v2572_v20  ;;  %v2586_v36 = vsub.f32 %v249_v2, %v315_v6  ;;  %v2588_v37 = vsub.f32 %v251_v5, %v319_v9  ;;  %v267_v46 = vld [vmem:[#allocation3 + $0x90] sm:$0xff]  ;;  %v339_v49 = vand.u32 4294901760, %v261_v33  ;;  %v270_v51 = vld [vmem:[#allocation3 + $0xa8] sm:$0xff]  ;;  %s1898_s20 = sshll.u32 %s2620_s19, 3 }
  0x3e   : > { %3551 = vst [vmem:[#allocation13_spill] sm:$0xff] %v2582_v30  ;;  %3552 = vst [vmem:[#allocation14_spill] sm:$0xff] %v2584_v35  ;;  %v2590_v38 = vpack.c.bf16 %v333_v26, %v329_v25  ;;  %v2593_v41 = vsub.f32 %v254_v7, %v321_v10  ;;  %v2595_v42 = vsub.f32 %v256_v8, %v325_v11  ;;  %v343_v50 = vand.u32 4294901760, %v263_v34  ;;  %v272_v56 = vld [vmem:[#allocation3 + $0xb8] sm:$0xff]  ;;  %v269_v61 = vld [vmem:[#allocation3 + $0xa0] sm:$0xff]  ;;  %s198_s26 = scalar_lea.vmem %s3392_s1, %s1898_s20  ;;  %s203_s29 = scalar_lea.vmem %s3393_s2, %s1898_s20 }
  0x3f   : > { %3553 = vst [vmem:[#allocation15_spill] sm:$0xff] %v2586_v36  ;;  %3554 = vst [vmem:[#allocation16_spill] sm:$0xff] %v2588_v37  ;;  %v2597_v43 = vsub.f32 %v253_v12, %v323_v23  ;;  %v2599_v44 = vsub.f32 %v255_v13, %v327_v24  ;;  %v2603_v47 = vsub.f32 %v258_v14, %v329_v25  ;;  %v345_v54 = vand.u32 4294901760, %v266_v39  ;;  %v271_v62 = vld [vmem:[#allocation3 + $0xb0] sm:$0xff]  ;;  %v274_v3 = vld [vmem:[#allocation3 + $0xc8] sm:$0xff]  ;;  %s191_s30 = sand.u32 1, %s2450_s13  }
  0x40   : > { %3555 = vst [vmem:[#allocation17_spill] sm:$0xff] %v2590_v38  ;;  %3556 = vst [vmem:[#allocation18_spill] sm:$0xff] %v2593_v41  ;;  %1908 = vmatpush1.bf16.msra.mxu1 %v2582_v30  ;;  %2100 = vmatpush1.bf16.msra.mxu0 %v2582_v30  ;;  %v2605_v48 = vpack.c.bf16 %v335_v28, %v331_v27  ;;  %v2608_v52 = vsub.f32 %v260_v16, %v333_v26  ;;  %v349_v55 = vand.u32 4294901760, %v268_v40  ;;  %v276_v4 = vld [vmem:[#allocation3 + $0xd8] sm:$0xff]  ;;  %v273_v9 = vld [vmem:[#allocation3 + $0xc0] sm:$0xff]  ;;  %s1888_s4 = sshll.u32 %s191_s30, 1 }
  0x41   : > { %3557 = vst [vmem:[#allocation19_spill] sm:$0xff] %v2595_v42  ;;  %3558 = vst [vmem:[#allocation20_spill] sm:$0xff] %v2597_v43  ;;  %1910 = vmatprep.subr.bf16.mxu1 %v2590_v38  ;;  %2102 = vmatprep.subr.bf16.mxu0 %v2590_v38  ;;  %v2611_v53 = vpack.c.bf16 %v341_v32, %v337_v31  ;;  %v2613_v57 = vsub.f32 %v257_v17, %v331_v27  ;;  %v347_v59 = vand.u32 4294901760, %v265_v45  ;;  %v275_v10 = vld [vmem:[#allocation3 + $0xd0] sm:$0xff]  ;;  %v280_v23 = vld [vmem:[#allocation3 + $0xf8] sm:$0xff]  ;;  %s1900_s5 = sshll.u32 %s2506_s16, 5 }
  0x42   : > { %3559 = vst [vmem:[#allocation21_spill] sm:$0xff] %v2603_v47  ;;  %3560 = vst [vmem:[#allocation22_spill] sm:$0xff] %v2605_v48  ;;  %v2615_v58 = vsub.f32 %v259_v18, %v335_v28  ;;  %v351_v60 = vand.u32 4294901760, %v267_v46  ;;  %v2622_v63 = vsub.f32 %v262_v21, %v337_v31  ;;  %v2624_v0 = vsub.f32 %v264_v22, %v341_v32  ;;  %v278_v22 = vld [vmem:[#allocation3 + $0xe8] sm:$0xff]  ;;  %v277_v28 = vld [vmem:[#allocation3 + $0xe0] sm:$0xff]  ;;  %s193_s6 = scalar_lea.vmem [#allocation6], %s1888_s4  ;;  %s3349_s10 = scalar_lea.hbm %s3394_s3, %s1900_s5 }
  0x43   : > { %3561 = vst [vmem:[#allocation23_spill] sm:$0xff] %v2608_v52  ;;  %3562 = vst [vmem:[#allocation24_spill] sm:$0xff] %v2611_v53  ;;  %v2626_v1 = vpack.c.bf16 %v343_v50, %v339_v49  ;;  %v353_v2 = vand.u32 4294901760, %v270_v51  ;;  %v2630_v5 = vsub.f32 %v261_v33, %v339_v49  ;;  %v2632_v6 = vsub.f32 %v263_v34, %v343_v50  ;;  %v279_v31 = vld [vmem:[#allocation3 + $0xf0] sm:$0xff]  ;;  %v289_v20 = vld [vmem:[#allocation3 + $0x140] sm:$0xff]  ;;  %s1799_s7 = sshll.u32 %s193_s6, 4  ;;  %s3351_s7 = int_to_ptr.vmem [resolvable:$true] %s1799_s7 }
  0x44   : > { %3563 = vst [vmem:[#allocation25_spill] sm:$0xff] %v2613_v57  ;;  %3564 = vst [vmem:[#allocation26_spill] sm:$0xff] %v2615_v58  ;;  %1912 = vmatpush1.bf16.msra.mxu1 %v2605_v48  ;;  %2104 = vmatpush1.bf16.msra.mxu0 %v2605_v48  ;;  %v2634_v7 = vsub.f32 %v266_v39, %v345_v54  ;;  %v357_v8 = vand.u32 4294901760, %v272_v56  ;;  %v2638_v11 = vpack.c.bf16 %v349_v55, %v345_v54  ;;  %v282_v39 = vld [vmem:[#allocation3 + $0x108] sm:$0xff]  ;;  %v291_v19 = vld [vmem:[#allocation3 + $0x150] sm:$0xff]  ;;  %s1785_s11 = scalar_lea.sflag [#allocation5], %s191_s30 }
  0x45   : > { %3565 = vst [vmem:[#allocation27_spill] sm:$0xff] %v2626_v1  ;;  %3566 = vst [vmem:[#allocation28_spill] sm:$0xff] %v2630_v5  ;;  %1914 = vmatprep.subr.bf16.mxu1 %v2611_v53  ;;  %2106 = vmatprep.subr.bf16.mxu0 %v2611_v53  ;;  %v2640_v12 = vsub.f32 %v268_v40, %v349_v55  ;;  %v355_v13 = vand.u32 4294901760, %v269_v61  ;;  %v359_v14 = vand.u32 4294901760, %v271_v62  ;;  %v361_v18 = vand.u32 4294901760, %v274_v3  ;;  %v284_v40 = vld [vmem:[#allocation3 + $0x118] sm:$0xff] }
  0x46   : > { %3567 = vst [vmem:[#allocation29_spill] sm:$0xff] %v2632_v6  ;;  %3568 = vst [vmem:[#allocation30_spill] sm:$0xff] %v2634_v7  ;;  %v2642_v16 = vpack.c.bf16 %v351_v60, %v347_v59  ;;  %v2644_v17 = vsub.f32 %v265_v45, %v347_v59  ;;  %v365_v21 = vand.u32 4294901760, %v276_v4  ;;  %v2647_v24 = vsub.f32 %v267_v46, %v351_v60  ;;  %v281_v59 = vld [vmem:[#allocation3 + $0x100] sm:$0xff]  ;;  %v283_v60 = vld [vmem:[#allocation3 + $0x110] sm:$0xff]  ;;  %s2392_s17 = scalar_lea.vmem %s3351_s7, 32 }
  0x47   : > { %3569 = vst [vmem:[#allocation31_spill] sm:$0xff] %v2638_v11  ;;  %3570 = vst [vmem:[#allocation32_spill] sm:$0xff] %v2640_v12  ;;  %v2649_v25 = vsub.f32 %v270_v51, %v353_v2  ;;  %v363_v26 = vand.u32 4294901760, %v273_v9  ;;  %v367_v27 = vand.u32 4294901760, %v275_v10  ;;  %v2653_v32 = vpack.c.bf16 %v357_v8, %v353_v2  ;;  %v287_v53 = vld [vmem:[#allocation3 + $0x130] sm:$0xff]  ;;  %p2393_p6 = scmp.ne.s32.totalorder %s3351_s7, %s2392_s17  ;;  %p3800_p9 = scmp.ne.s32.totalorder %s3540_s22, 0 }
  0x48   : > { %3571 = vst [vmem:[#allocation33_spill] sm:$0xff] %v2642_v16  ;;  %3572 = vst [vmem:[#allocation34_spill] sm:$0xff] %v2644_v17  ;;  %1916 = vmatpush1.bf16.msra.mxu1 %v2626_v1  ;;  %2108 = vmatpush1.bf16.msra.mxu0 %v2626_v1  ;;  %v2655_v33 = vsub.f32 %v272_v56, %v357_v8  ;;  %v2657_v34 = vsub.f32 %v269_v61, %v355_v13  ;;  %v369_v49 = vand.u32 4294901760, %v278_v22  ;;  %v285_v1 = vld [vmem:[#allocation3 + $0x120] sm:$0xff]  ;;  %s2464_s16 = smov [#allocation6]  }
  0x49   : > { %3573 = vst [vmem:[#allocation35_spill] sm:$0xff] %v2647_v24  ;;  %3574 = vst [vmem:[#allocation36_spill] sm:$0xff] %v2649_v25  ;;  %1918 = vmatprep.subr.bf16.mxu1 %v2638_v11  ;;  %2110 = vmatprep.subr.bf16.mxu0 %v2638_v11  ;;  %v2661_v45 = vpack.c.bf16 %v359_v14, %v355_v13  ;;  %v2663_v46 = vsub.f32 %v271_v62, %v359_v14  ;;  %v373_v50 = vand.u32 4294901760, %v280_v23  ;;  %v286_v13 = vld [vmem:[#allocation3 + $0x128] sm:$0xff]  ;;  %v288_v14 = vld [vmem:[#allocation3 + $0x138] sm:$0xff]  ;;  %p2394_p10 = pnand %p2393_p6, %p3800_p9  ;;  %s2396_s19 = sshll.u32 %s2464_s16, 4  ;;  %s2397_s19 = int_to_ptr.vmem [resolvable:$false] %s2396_s19 }
  0x4a   : > { %3575 = vst [vmem:[#allocation37_spill] sm:$0xff] %v2653_v32  ;;  %3576 = vst [vmem:[#allocation38_spill] sm:$0xff] %v2655_v33  ;;  %v2670_v51 = vpack.c.bf16 %v365_v21, %v361_v18  ;;  %v2672_v54 = vsub.f32 %v274_v3, %v361_v18  ;;  %v371_v55 = vand.u32 4294901760, %v277_v28  ;;  %v375_v56 = vand.u32 4294901760, %v279_v31  ;;  %s2398_s20 = scalar_lea.vmem %s2397_s19, 64  ;;  %p2399_p2 = scmp.lt.s32.totalorder %s3351_s7, %s2397_s19 }
  0x4b   : > { %3577 = vst [vmem:[#allocation39_spill] sm:$0xff] %v2657_v34  ;;  %3578 = vst [vmem:[#allocation40_spill] sm:$0xff] %v2661_v45  ;;  %v2674_v61 = vsub.f32 %v276_v4, %v365_v21  ;;  %v2676_v2 = vpack.c.bf16 %v367_v27, %v363_v26  ;;  %v377_v62 = vand.u32 4294901760, %v282_v39  ;;  %v381_v8 = vand.u32 4294901760, %v284_v40  ;;  %v2686_v4 = vld [vmem:[%s198_s26] sm:$0x77]  ;;  %p2395_p12 = pneg %p2394_p10  ;;  %p2400_p3 = scmp.lt.s32.totalorder %s2398_s20, %s2392_s17 }
  0x4c   : > { %3579 = vst [vmem:[#allocation41_spill] sm:$0xff] %v2663_v46  ;;  %3580 = vst [vmem:[#allocation42_spill] sm:$0xff] %v2670_v51  ;;  %1920 = vmatpush1.bf16.msra.mxu1 %v2642_v16  ;;  %2112 = vmatpush1.bf16.msra.mxu0 %v2642_v16  ;;  %v2680_v11 = vsub.f32 %v273_v9, %v363_v26  ;;  %v2682_v3 = vsub.f32 %v275_v10, %v367_v27  ;;  %v379_v38 = vand.u32 4294901760, %v281_v59  ;;  %v290_v9 = vld [vmem:[#allocation3 + $0x148] sm:$0xff]  ;;  %v292_v26 = vld [vmem:[#allocation3 + $0x158] sm:$0xff] }
  0x4d   : > { %3581 = vst [vmem:[#allocation43_spill] sm:$0xff] %v2672_v54  ;;  %3582 = vst [vmem:[#allocation44_spill] sm:$0xff] %v2674_v61  ;;  %v2684_v18 = vsub.f32 %v278_v22, %v369_v49  ;;  %1922 = vmatprep.subr.bf16.mxu1 %v2653_v32  ;;  %2114 = vmatprep.subr.bf16.mxu0 %v2653_v32  ;;  %v2690_v21 = vpack.c.bf16 %v373_v50, %v369_v49  ;;  %v383_v16 = vand.u32 4294901760, %v283_v60  ;;  %v299_v54 = vld [vmem:[#allocation3 + $0x190] sm:$0xff]  ;;  %v306_v46 = vld [vmem:[#allocation3 + $0x1c8] sm:$0xff]  ;;  %p2401_p4 = por %p2400_p3, %p2399_p2 }
  0x4e   : > { %3583 = vst [vmem:[#allocation45_spill] sm:$0xff] %v2676_v2  ;;  %3584 = vst [vmem:[#allocation46_spill] sm:$0xff] %v2680_v11  ;;  %v2692_v48 = vsub.f32 %v280_v23, %v373_v50  ;;  %v2695_v10 = vpack.c.bf16 %v375_v56, %v371_v55  ;;  %v2697_v22 = vsub.f32 %v277_v28, %v371_v55  ;;  %v385_v27 = vand.u32 4294901760, %v286_v13 }
  0x4f   : > { %3585 = vst [vmem:[#allocation47_spill] sm:$0xff] %v2682_v3  ;;  %3586 = vst [vmem:[#allocation48_spill] sm:$0xff] %v2684_v18  ;;  %v389_v30 = vand.u32 4294901760, %v288_v14  ;;  %v2699_v15 = vsub.f32 %v279_v31, %v375_v56  ;;  %v2701_v49 = vpack.c.bf16 %v381_v8, %v377_v62  ;;  %v387_v23 = vand.u32 4294901760, %v285_v1  ;;  %v296_v18 = vld [vmem:[#allocation3 + $0x178] sm:$0xff]  ;;  %p2402_p7 = pnand %p2401_p4, %p2395_p12 }
  0x50   : > { %3587 = vst [vmem:[#allocation49_spill] sm:$0xff] %v2686_v4  ;;  %3588 = vst [vmem:[#allocation50_spill] sm:$0xff] %v2690_v21  ;;  %v391_v50 = vand.u32 4294901760, %v287_v53  ;;  %1924 = vmatpush1.bf16.msra.mxu1 %v2661_v45  ;;  %2116 = vmatpush1.bf16.msra.mxu0 %v2661_v45  ;;  %v2705_v32 = vsub.f32 %v282_v39, %v377_v62  ;;  %v393_v28 = vand.u32 4294901760, %v290_v9  ;;  %v397_v55 = vand.u32 4294901760, %v292_v26  ;;  %v295_v45 = vld [vmem:[#allocation3 + $0x170] sm:$0xff] }
  0x51   : > { %3589 = vst [vmem:[#allocation51_spill] sm:$0xff] %v2692_v48  ;;  %209 = vst [vmem:[#allocation2] sm:$0x7] %v2686_v4  ;;  %v2707_v48 = vsub.f32 %v284_v40, %v381_v8  ;;  %1926 = vmatprep.subr.bf16.mxu1 %v2670_v51  ;;  %2118 = vmatprep.subr.bf16.mxu0 %v2670_v51  ;;  %v2711_v31 = vpack.c.bf16 %v383_v16, %v379_v38  ;;  %v399_v3 = vand.u32 4294901760, %v291_v19  ;;  %v293_v8 = vld [vmem:[#allocation3 + $0x160] sm:$0xff] }
  0x52   : > { %3590 = vst [vmem:[#allocation52_spill] sm:$0xff] %v2695_v10  ;;  %3591 = vst [vmem:[#allocation53_spill] sm:$0xff] %v2697_v22  ;;  %v294_v22 = vld [vmem:[#allocation3 + $0x168] sm:$0xff]  ;;  %v2713_v56 = vsub.f32 %v281_v59, %v379_v38  ;;  %v2715_v11 = vsub.f32 %v283_v60, %v383_v16  ;;  %v2717_v39 = vpack.c.bf16 %v389_v30, %v385_v27  ;;  %v405_v38 = vand.u32 4294901760, %v296_v18  ;;  %v300_v59 = vld [vmem:[#allocation3 + $0x198] sm:$0xff] }
  0x53   : > { %3592 = vst [vmem:[#allocation54_spill] sm:$0xff] %v2699_v15  ;;  %3593 = vst [vmem:[#allocation55_spill] sm:$0xff] %v2701_v49  ;;  %v395_v15 = vand.u32 4294901760, %v289_v20  ;;  %v2719_v40 = vsub.f32 %v286_v13, %v385_v27  ;;  %v2721_v62 = vsub.f32 %v288_v14, %v389_v30  ;;  %v2725_v51 = vsub.f32 %v285_v1, %v387_v23 }
  0x54   : > { %3594 = vst [vmem:[#allocation56_spill] sm:$0xff] %v2705_v32  ;;  %3595 = vst [vmem:[#allocation57_spill] sm:$0xff] %v2707_v48  ;;  %v298_v48 = vld [vmem:[#allocation3 + $0x188] sm:$0xff]  ;;  %v2723_v32 = vpack.c.bf16 %v391_v50, %v387_v23  ;;  %v401_v61 = vand.u32 4294901760, %v294_v22  ;;  %1928 = vmatpush1.bf16.msra.mxu1 %v2676_v2  ;;  %2120 = vmatpush1.bf16.msra.mxu0 %v2676_v2  ;;  %v2729_v16 = vsub.f32 %v287_v53, %v391_v50 }
  0x55   : > { %3596 = vst [vmem:[#allocation58_spill] sm:$0xff] %v2711_v31  ;;  %3597 = vst [vmem:[#allocation59_spill] sm:$0xff] %v2713_v56  ;;  %v297_v56 = vld [vmem:[#allocation3 + $0x180] sm:$0xff]  ;;  %v2731_v30 = vpack.c.bf16 %v397_v55, %v393_v28  ;;  %v2733_v60 = vsub.f32 %v290_v9, %v393_v28  ;;  %1930 = vmatprep.subr.bf16.mxu1 %v2690_v21  ;;  %2122 = vmatprep.subr.bf16.mxu0 %v2690_v21  ;;  %v403_v14 = vand.u32 4294901760, %v293_v8  ;;  %v302_v23 = vld [vmem:[#allocation3 + $0x1a8] sm:$0xff] }
  0x56   : > { %3598 = vst [vmem:[#allocation60_spill] sm:$0xff] %v2715_v11  ;;  %3599 = vst [vmem:[#allocation61_spill] sm:$0xff] %v2717_v39  ;;  %v2737_v1 = vsub.f32 %v292_v26, %v397_v55  ;;  %v2739_v13 = vpack.c.bf16 %v399_v3, %v395_v15  ;;  %v407_v27 = vand.u32 4294901760, %v295_v45  ;;  %v413_v2 = vand.u32 4294901760, %v300_v59 }
  0x57   : > { %3600 = vst [vmem:[#allocation62_spill] sm:$0xff] %v2719_v40  ;;  %3601 = vst [vmem:[#allocation63_spill] sm:$0xff] %v2721_v62  ;;  %v409_v62 = vand.u32 4294901760, %v298_v48  ;;  %v411_v53 = vand.u32 4294901760, %v297_v56  ;;  %v415_v50 = vand.u32 4294901760, %v299_v54  ;;  %v303_v40 = vld [vmem:[#allocation3 + $0x1b0] sm:$0xff]  ;;  %v2741_v9 = vsub.f32 %v289_v20, %v395_v15 }
  0x58   : > { %3602 = vst [vmem:[#allocation64_spill] sm:$0xff] %v2723_v32  ;;  %3603 = vst [vmem:[#allocation65_spill] sm:$0xff] %v2725_v51  ;;  %v304_v51 = vld [vmem:[#allocation3 + $0x1b8] sm:$0xff]  ;;  %v2743_v28 = vsub.f32 %v291_v19, %v399_v3  ;;  %v2747_v26 = vsub.f32 %v294_v22, %v401_v61  ;;  %1932 = vmatpush1.bf16.msra.mxu1 %v2695_v10  ;;  %2124 = vmatpush1.bf16.msra.mxu0 %v2695_v10  ;;  %v423_v3 = vand.u32 4294901760, %v303_v40  ;;  %v305_v22 = vld [vmem:[#allocation3 + $0x1c0] sm:$0xff] }
  0x59   : > { %3604 = vst [vmem:[#allocation66_spill] sm:$0xff] %v2729_v16  ;;  %3605 = vst [vmem:[#allocation67_spill] sm:$0xff] %v2731_v30  ;;  %v301_v16 = vld [vmem:[#allocation3 + $0x1a0] sm:$0xff]  ;;  %v2751_v55 = vsub.f32 %v296_v18, %v405_v38  ;;  %v2753_v21 = vsub.f32 %v293_v8, %v403_v14  ;;  %v421_v11 = vand.u32 4294901760, %v304_v51  ;;  %v308_v15 = vld [vmem:[#allocation3 + $0x1d8] sm:$0xff]  ;;  %1934 = vmatprep.subr.bf16.mxu1 %v2701_v49  ;;  %2126 = vmatprep.subr.bf16.mxu0 %v2701_v49 }
  0x5a   : > { %3606 = vst [vmem:[#allocation68_spill] sm:$0xff] %v2733_v60  ;;  %3607 = vst [vmem:[#allocation69_spill] sm:$0xff] %v2737_v1  ;;  %v2745_v60 = vpack.c.bf16 %v405_v38, %v401_v61  ;;  %v417_v1 = vand.u32 4294901760, %v302_v23  ;;  %v2757_v19 = vpack.c.bf16 %v407_v27, %v403_v14  ;;  %v2759_v20 = vsub.f32 %v295_v45, %v407_v27  ;;  %v307_v10 = vld [vmem:[#allocation3 + $0x1d0] sm:$0xff] }
  0x5b   : > { %3608 = vst [vmem:[#allocation70_spill] sm:$0xff] %v2739_v13  ;;  %3609 = vst [vmem:[#allocation71_spill] sm:$0xff] %v2741_v9  ;;  %v419_v61 = vand.u32 4294901760, %v301_v16  ;;  %v2766_v18 = vpack.c.bf16 %v413_v2, %v409_v62  ;;  %v2768_v8 = vsub.f32 %v298_v48, %v409_v62  ;;  %v2770_v38 = vsub.f32 %v300_v59, %v413_v2  ;;  %v2784_v62 = vld [vmem:[%s203_s29] sm:$0x77] }
  0x5c   : > { %3610 = vst [vmem:[#allocation72_spill] sm:$0xff] %v2743_v28  ;;  %3611 = vst [vmem:[#allocation73_spill] sm:$0xff] %v2745_v60  ;;  %v2772_v49 = vpack.c.bf16 %v415_v50, %v411_v53  ;;  %v2774_v14 = vsub.f32 %v297_v56, %v411_v53  ;;  %v2776_v45 = vsub.f32 %v299_v54, %v415_v50  ;;  %v425_v27 = vand.u32 4294901760, %v306_v46 }
  0x5d   : > { %3612 = vst [vmem:[#allocation74_spill] sm:$0xff] %v2747_v26  ;;  %3613 = vst [vmem:[#allocation75_spill] sm:$0xff] %v2751_v55  ;;  %1936 = vmatpush1.bf16.msra.mxu1 %v2711_v31  ;;  %2128 = vmatpush1.bf16.msra.mxu0 %v2711_v31  ;;  %v2780_v55 = vpack.c.bf16 %v421_v11, %v417_v1  ;;  %v2782_v26 = vsub.f32 %v302_v23, %v417_v1  ;;  %v427_v48 = vand.u32 4294901760, %v305_v22  ;;  %v312_v1 = vld [vmem:[#allocation3 + $0x1f8] sm:$0xff] }
  0x5e   : > { %3614 = vst [vmem:[#allocation76_spill] sm:$0xff] %v2753_v21  ;;  %3615 = vst [vmem:[#allocation77_spill] sm:$0xff] %v2757_v19  ;;  %v310_v21 = vld [vmem:[#allocation3 + $0x1e8] sm:$0xff]  ;;  %v431_v2 = vand.u32 4294901760, %v307_v10  ;;  %1938 = vmatprep.subr.bf16.mxu1 %v2717_v39  ;;  %2130 = vmatprep.subr.bf16.mxu0 %v2717_v39  ;;  %v2788_v54 = vsub.f32 %v304_v51, %v421_v11  ;;  %v2790_v56 = vpack.c.bf16 %v423_v3, %v419_v61 }
  0x5f   : > { %3616 = vst [vmem:[#allocation78_spill] sm:$0xff] %v2759_v20  ;;  %3617 = vst [vmem:[#allocation79_spill] sm:$0xff] %v2766_v18  ;;  %v429_v20 = vand.u32 4294901760, %v308_v15  ;;  %v2792_v59 = vsub.f32 %v301_v16, %v419_v61  ;;  %v2794_v53 = vsub.f32 %v303_v40, %v423_v3  ;;  %v2796_v50 = vsub.f32 %v306_v46, %v425_v27 }
  0x60   : > { %3618 = vst [vmem:[#allocation80_spill] sm:$0xff] %v2772_v49  ;;  %3619 = vst [vmem:[#allocation81_spill] sm:$0xff] %v2776_v45  ;;  %v433_v23 = vand.u32 4294901760, %v310_v21  ;;  %v207_v31 = vcombine.high %v2686_v4, %v2686_v4  ;;  %v212_v39 = vcombine.high %v2784_v62, %v2784_v62  ;;  %v219_v11 = vmul.f32 %v2686_v4, %v2686_v4 }
  0x61   : > { %3620 = vst [vmem:[#allocation82_spill] sm:$0xff] %v2780_v55  ;;  %3621 = vst [vmem:[#allocation83_spill] sm:$0xff] %v2782_v26  ;;  %v2800_v26 = vpack.c.bf16 %v429_v20, %v425_v27  ;;  %v476_v51 = vand.u32 4294901760, %v2578_v29  ;;  %1940 = vmatpush1.bf16.msra.mxu1 %v2723_v32  ;;  %2132 = vmatpush1.bf16.msra.mxu0 %v2723_v32  ;;  %v2809_v46 = vsub.f32 %v308_v15, %v429_v20  ;;  %v309_v27 = vld [vmem:[#allocation3 + $0x1e0] sm:$0xff]  ;;  %v311_v15 = vld [vmem:[#allocation3 + $0x1f0] sm:$0xff] }
  0x62   : > { %3622 = vst [vmem:[#allocation84_spill] sm:$0xff] %v2784_v62  ;;  %3623 = vst [vmem:[#allocation85_spill] sm:$0xff] %v2788_v54  ;;  %v2811_v40 = vpack.c.bf16 %v431_v2, %v427_v48  ;;  %v488_v16 = vand.u32 4294901760, %v2584_v35  ;;  %v213_v61 = vrot.slane %v2784_v62, 5  ;;  %1942 = vmatprep.subr.bf16.mxu1 %v2731_v30  ;;  %2134 = vmatprep.subr.bf16.mxu0 %v2731_v30  ;;  %v437_v3 = vand.u32 4294901760, %v312_v1 }
  0x63   : > { %3624 = vst [vmem:[#allocation86_spill] sm:$0xff] %v2790_v56  ;;  %3625 = vst [vmem:[#allocation87_spill] sm:$0xff] %v2792_v59  ;;  %v214_v4 = vrot.slane %v212_v39, 5  ;;  %v2817_v59 = vsub.f32 %v305_v22, %v427_v48  ;;  %v477_v20 = vsub.f32 %v2578_v29, %v476_v51  ;;  %v494_v32 = vand.u32 4294901760, %v2588_v37 }
  0x64   : > { %3626 = vst [vmem:[#allocation88_spill] sm:$0xff] %v2794_v53  ;;  %3627 = vst [vmem:[#allocation89_spill] sm:$0xff] %v2796_v50  ;;  %v221_v50 = vcombine.high %v219_v11, %v219_v11  ;;  %v222_v53 = vrot.slane %v219_v11, 2  ;;  %v500_v30 = vand.u32 4294901760, %v2593_v41  ;;  %v512_v39 = vand.u32 4294901760, %v2595_v42 }
  0x65   : > { %3628 = vst [vmem:[#allocation90_spill] sm:$0xff] %v2800_v26  ;;  %3629 = vst [vmem:[#allocation91_spill] sm:$0xff] %v2809_v46  ;;  %v489_v46 = vsub.f32 %v2584_v35, %v488_v16  ;;  %1944 = vmatpush1.bf16.msra.mxu1 %v2739_v13  ;;  %2136 = vmatpush1.bf16.msra.mxu0 %v2739_v13  ;;  %v2827_v22 = vsub.f32 %v307_v10, %v431_v2  ;;  %v435_v48 = vand.u32 4294901760, %v309_v27 }
  0x66   : > { %3630 = vst [vmem:[#allocation92_spill] sm:$0xff] %v2811_v40  ;;  %210 = vst [vmem:[#allocation2 + $0x8] sm:$0x7] %v207_v31  ;;  %v482_v31 = vand.u32 4294901760, %v2586_v36  ;;  %v223_v62 = vrot.slane %v221_v50, 2  ;;  %1946 = vmatprep.subr.bf16.mxu1 %v2745_v60  ;;  %2138 = vmatprep.subr.bf16.mxu0 %v2745_v60  ;;  %v439_v50 = vand.u32 4294901760, %v311_v15  ;;  %v2838_v13 = vsub.f32 %v312_v1, %v437_v3 }
  0x67   : > { %3631 = vst [vmem:[#allocation93_spill] sm:$0xff] %v2817_v59  ;;  %217 = vst [vmem:[#allocation2] sm:$0x38] %v213_v61  ;;  %v495_v61 = vsub.f32 %v2588_v37, %v494_v32  ;;  %v506_v35 = vand.u32 4294901760, %v2597_v43  ;;  %v2840_v10 = vsub.f32 %v309_v27, %v435_v48  ;;  %v478_v2 = vand.u32 4294901760, %v477_v20 }
  0x68   : > { %218 = vst [vmem:[#allocation2 + $0x8] sm:$0x38] %v214_v4  ;;  %226 = vst [vmem:[#allocation2 + $0x10] ss:$-12 sps:$4 sm:$0xc1] %v222_v53   ;;  %v483_v11 = vsub.f32 %v2586_v36, %v482_v31  ;;  %v2833_v4 = vpack.c.bf16 %v437_v3, %v433_v23  ;;  %v2835_v53 = vsub.f32 %v310_v21, %v433_v23  ;;  %v518_v36 = vand.u32 4294901760, %v2599_v44 }
  0x69   : > { %3632 = vst [vmem:[#allocation94_spill] sm:$0xff] %v2827_v22  ;;  %227 = vst [vmem:[#allocation2 + $0x18] ss:$-12 sps:$4 sm:$0xc1] %v223_v62   ;;  %v490_v37 = vand.u32 4294901760, %v489_v46  ;;  %v501_v29 = vsub.f32 %v2593_v41, %v500_v30  ;;  %v513_v60 = vsub.f32 %v2595_v42, %v512_v39  ;;  %v524_v22 = vand.u32 4294901760, %v2603_v47  ;;  %1948 = vmatpush1.bf16.msra.mxu1 %v2757_v19 }
  0x6a   : > { %3633 = vst [vmem:[#allocation95_spill] sm:$0xff] %v2833_v4  ;;  %2140 = vmatpush1.bf16.msra.mxu0 %v2757_v19  ;;  %v484_v21 = vand.u32 4294901760, %v483_v11  ;;  %v496_v62 = vand.u32 4294901760, %v495_v61  ;;  %v507_v1 = vsub.f32 %v2597_v43, %v506_v35  ;;  %v536_v23 = vand.u32 4294901760, %v2608_v52  ;;  %1950 = vmatprep.subr.bf16.mxu1 %v2766_v18 }
  0x6b   : > { %2142 = vmatprep.subr.bf16.mxu0 %v2766_v18  ;;  %v2852_v46 = vpack.c.bf16 %v439_v50, %v435_v48  ;;  %v2854_v3 = vsub.f32 %v311_v15, %v439_v50  ;;  %v519_v27 = vsub.f32 %v2599_v44, %v518_v36  ;;  %v530_v20 = vand.u32 4294901760, %v2613_v57 }
  0x6c   : > { %v2858_v42 = vpack.c.bf16 %v488_v16, %v476_v51  ;;  %v2860_v61 = vpack.c.bf16 %v494_v32, %v482_v31  ;;  %v2862_v19 = vpack.c.bf16 %v512_v39, %v500_v30  ;;  %v542_v41 = vand.u32 4294901760, %v2615_v58 }
  0x6d   : > { %3634 = vst [vmem:[#allocation96_spill] sm:$0xff] %v2852_v46  ;;  %v2865_v43 = vpack.c.bf16 %v490_v37, %v478_v2  ;;  %v525_v15 = vsub.f32 %v2603_v47, %v524_v22  ;;  %v537_v48 = vsub.f32 %v2608_v52, %v536_v23  ;;  %1952 = vmatpush1.bf16.msra.mxu1 %v2772_v49  ;;  %v502_v32 = vand.u32 4294901760, %v501_v29 }
  0x6e   : > { %2144 = vmatpush1.bf16.msra.mxu0 %v2772_v49  ;;  %v2873_v16 = vpack.c.bf16 %v496_v62, %v484_v21  ;;  %v514_v30 = vand.u32 4294901760, %v513_v60  ;;  %v508_v31 = vand.u32 4294901760, %v507_v1  ;;  %1954 = vmatprep.subr.bf16.mxu1 %v2780_v55  ;;  %v520_v50 = vand.u32 4294901760, %v519_v27 }
  0x6f   : > { %v245_v11 = vld [vmem:[#allocation2] sm:$0xff]  ;;  %2146 = vmatprep.subr.bf16.mxu0 %v2780_v55  ;;  %v531_v2 = vsub.f32 %v2613_v57, %v530_v20  ;;  %v2883_v52 = vpack.c.bf16 %v518_v36, %v506_v35  ;;  %v543_v21 = vsub.f32 %v2615_v58, %v542_v41  ;;  %v548_v29 = vand.u32 4294901760, %v2622_v63 }
  0x70   : > { %v2867_v18 = vand.u32 4294901760, %v245_v11  ;;  %v246_v51 = vld [vmem:[#allocation2 + $0x8] sm:$0xff]  ;;  %v560_v60 = vand.u32 4294901760, %v2624_v0  ;;  %v526_v55 = vand.u32 4294901760, %v525_v15  ;;  %v538_v49 = vand.u32 4294901760, %v537_v48 }
  0x71   : > { %v2877_v37 = vand.u32 4294901760, %v246_v51  ;;  %1956 = vmatpush1.bf16.msra.mxu1 %v2790_v56  ;;  %v2894_v27 = vpack.c.bf16 %v514_v30, %v502_v32  ;;  %v554_v35 = vand.u32 4294901760, %v2630_v5  ;;  %v566_v36 = vand.u32 4294901760, %v2632_v6 }
  0x72   : > { %3635 = vst [vmem:[#allocation97_spill] sm:$0xff] %v2867_v18  ;;  %v2880_v39 = vsub.f32 %v245_v11, %v2867_v18  ;;  %2148 = vmatpush1.bf16.msra.mxu0 %v2790_v56  ;;  %v572_v11 = vand.u32 4294901760, %v2634_v7  ;;  %1958 = vmatprep.subr.bf16.mxu1 %v2800_v26  ;;  %v2902_v15 = vpack.c.bf16 %v520_v50, %v508_v31  ;;  %v532_v18 = vand.u32 4294901760, %v531_v2 }
  0x73   : > { %3636 = vst [vmem:[#allocation98_spill] sm:$0xff] %v2877_v37  ;;  %v2889_v62 = vsub.f32 %v246_v51, %v2877_v37  ;;  %2150 = vmatprep.subr.bf16.mxu0 %v2800_v26  ;;  %v2904_v48 = vpack.c.bf16 %v536_v23, %v524_v22  ;;  %v544_v56 = vand.u32 4294901760, %v543_v21  ;;  %v549_v32 = vsub.f32 %v2622_v63, %v548_v29 }
  0x74   : > { %3637 = vst [vmem:[#allocation99_spill] sm:$0xff] %v2880_v39  ;;  %v449_v1 = vand.u32 4294901760, %v2880_v39  ;;  %v561_v30 = vsub.f32 %v2624_v0, %v560_v60  ;;  %v584_v37 = vand.u32 4294901760, %v2640_v12  ;;  %v2911_v26 = vpack.c.bf16 %v538_v49, %v526_v55 }
  0x75   : > { %3638 = vst [vmem:[#allocation100_spill] sm:$0xff] %v2889_v62  ;;  %v443_v51 = vand.u32 4294901760, %v2889_v62  ;;  %v2913_v47 = vpack.c.bf16 %v542_v41, %v530_v20  ;;  %1960 = vmatpush1.bf16.msra.mxu1 %v2811_v40  ;;  %v555_v22 = vsub.f32 %v2630_v5, %v554_v35  ;;  %v567_v23 = vsub.f32 %v2632_v6, %v566_v36 }
  0x76   : > { %v450_v57 = vsub.f32 %v2880_v39, %v449_v1  ;;  %2152 = vmatpush1.bf16.msra.mxu0 %v2811_v40  ;;  %v573_v31 = vsub.f32 %v2634_v7, %v572_v11  ;;  %1962 = vmatprep.subr.bf16.mxu1 %v2833_v4  ;;  %v585_v49 = vsub.f32 %v2640_v12, %v584_v37  ;;  %v578_v41 = vand.u32 4294901760, %v2644_v17 }
  0x77   : > { %v444_v58 = vsub.f32 %v2889_v62, %v443_v51  ;;  %1219 = vmatprep.mubr.f32.mxu0 %v443_v51  ;;  %2154 = vmatprep.subr.bf16.mxu0 %v2833_v4  ;;  %v590_v55 = vand.u32 4294901760, %v2647_v24  ;;  %v2925_v20 = vpack.c.bf16 %v544_v56, %v532_v18  ;;  %v550_v2 = vand.u32 4294901760, %v549_v32  ;;  %v3639_v4 = vld [vmem:[#allocation41_spill] sm:$0xff] }
  0x78   : > { %v562_v21 = vand.u32 4294901760, %v561_v30  ;;  %v596_v51 = vand.u32 4294901760, %v2649_v25  ;;  %v451_v39 = vand.u32 4294901760, %v450_v57  ;;  %v608_v40 = vand.u32 4294901760, %v2655_v33 }
  0x79   : > { %v445_v50 = vand.u32 4294901760, %v444_v58  ;;  %v602_v62 = vand.u32 4294901760, %v2657_v34  ;;  %v614_v58 = vand.u32 4294901760, %v3639_v4  ;;  %1964 = vmatpush1.bf16.msra.mxu1 %v2852_v46  ;;  %v2933_v12 = vpack.c.bf16 %v560_v60, %v548_v29  ;;  %v3640_v60 = vld [vmem:[#allocation43_spill] sm:$0xff] }
  0x7a   : > { %2156 = vmatpush1.bf16.msra.mxu0 %v2852_v46  ;;  %v556_v18 = vand.u32 4294901760, %v555_v22  ;;  %v568_v56 = vand.u32 4294901760, %v567_v23  ;;  %v2935_v32 = vpack.c.bf16 %v566_v36, %v554_v35  ;;  %1966 = vmatprep.subr.bf16.mxu1 %v2865_v43  ;;  %v574_v57 = vand.u32 4294901760, %v573_v31  ;;  %v3641_v36 = vld [vmem:[#allocation44_spill] sm:$0xff]  ;;  %v3642_v31 = vld [vmem:[#allocation46_spill] sm:$0xff] }
  0x7b   : > { %446 = vmatprep.mubr.f32.mxu1 %v445_v50  ;;  %2158 = vmatprep.subr.bf16.mxu0 %v2858_v42  ;;  %v586_v30 = vand.u32 4294901760, %v585_v49  ;;  %v579_v50 = vsub.f32 %v2644_v17, %v578_v41  ;;  %v591_v7 = vsub.f32 %v2647_v24, %v590_v55  ;;  %v1977_v6 = vpack.c.bf16 %v562_v21, %v550_v2  ;;  %v3643_v2 = vld [vmem:[#allocation47_spill] sm:$0xff] }
  0x7c   : > { %v2941_v5 = vpack.c.bf16 %v584_v37, %v572_v11  ;;  %v597_v29 = vsub.f32 %v2649_v25, %v596_v51  ;;  %v620_v22 = vand.u32 4294901760, %v3640_v60  ;;  %452 = vmatmul.mubr.f32.vlgmr.msra.gmra.mrb[0].mxu1 %v451_v39  ;;  %v609_v35 = vsub.f32 %v2655_v33, %v608_v40  ;;  %v3645_v25 = vld [vmem:[#allocation51_spill] sm:$0xff] }
  0x7d   : > { %1223 = vmatmul.mubr.f32.vlgmr.msra.gmra.mrb[0].mxu0 %v449_v1  ;;  %v603_v43 = vsub.f32 %v2657_v34, %v602_v62  ;;  %v615_v42 = vsub.f32 %v3639_v4, %v614_v58  ;;  %v632_v23 = vand.u32 4294901760, %v3641_v36  ;;  %1968 = vmatpush1.bf16.msra.mxu1 %v2873_v16  ;;  %v1979_v37 = vpack.c.bf16 %v568_v56, %v556_v18  ;;  %v3644_v4 = vld [vmem:[#allocation48_spill] sm:$0xff] }
  0x7e   : > { %2160 = vmatpush1.bf16.msra.mxu0 %v2860_v61  ;;  %v2951_v11 = vpack.c.bf16 %v590_v55, %v578_v41  ;;  %v626_v49 = vand.u32 4294901760, %v3642_v31  ;;  %v638_v39 = vand.u32 4294901760, %v3643_v2  ;;  %1970 = vmatprep.subr.bf16.mxu1 %v2894_v27  ;;  %v1981_v1 = vpack.c.bf16 %v586_v30, %v574_v57  ;;  %v3646_v27 = vld [vmem:[#allocation53_spill] sm:$0xff] }
  0x7f   : > { %2162 = vmatprep.subr.bf16.mxu0 %v2862_v19  ;;  %v580_v21 = vand.u32 4294901760, %v579_v50  ;;  %v592_v46 = vand.u32 4294901760, %v591_v7  ;;  %v644_v34 = vand.u32 4294901760, %v3644_v4  ;;  %v598_v33 = vand.u32 4294901760, %v597_v29 }
  0x80   : > { %v2958_v16 = vpack.c.bf16 %v608_v40, %v596_v51  ;;  %v621_v61 = vsub.f32 %v3640_v60, %v620_v22  ;;  %v633_v41 = vsub.f32 %v3641_v36, %v632_v23  ;;  %v610_v55 = vand.u32 4294901760, %v609_v35  ;;  %v3647_v51 = vld [vmem:[#allocation54_spill] sm:$0xff]  ;;  %v3649_v60 = vld [vmem:[#allocation57_spill] sm:$0xff] }
  0x81   : > { %v604_v18 = vand.u32 4294901760, %v603_v43  ;;  %v616_v56 = vand.u32 4294901760, %v615_v42  ;;  %v656_v24 = vand.u32 4294901760, %v3645_v25  ;;  %1972 = vmatpush1.bf16.msra.mxu1 %v2902_v15  ;;  %v627_v7 = vsub.f32 %v3642_v31, %v626_v49  ;;  %v3648_v43 = vld [vmem:[#allocation56_spill] sm:$0xff] }
  0x82   : > { %2164 = vmatpush1.bf16.msra.mxu0 %v2883_v52  ;;  %v639_v19 = vsub.f32 %v3643_v2, %v638_v39  ;;  %v650_v40 = vand.u32 4294901760, %v3646_v27  ;;  %v662_v57 = vand.u32 4294901760, %v3647_v51  ;;  %1974 = vmatprep.subr.bf16.mxu1 %v2911_v26  ;;  %v2971_v30 = vpack.c.bf16 %v614_v58, %v602_v62 }
  0x83   : > { %2166 = vmatprep.subr.bf16.mxu0 %v2904_v48  ;;  %v645_v50 = vsub.f32 %v3644_v4, %v644_v34  ;;  %v657_v15 = vsub.f32 %v3645_v25, %v656_v24  ;;  %v1983_v29 = vpack.c.bf16 %v592_v46, %v580_v21  ;;  %v622_v52 = vand.u32 4294901760, %v621_v61  ;;  %v3699_v25 = vld [vmem:[#allocation69_spill] sm:$0xff] }
  0x84   : > { %v634_v35 = vand.u32 4294901760, %v633_v41  ;;  %v668_v42 = vand.u32 4294901760, %v3648_v43  ;;  %v1985_v2 = vpack.c.bf16 %v610_v55, %v598_v33  ;;  %v1987_v31 = vpack.c.bf16 %v616_v56, %v604_v18  ;;  %v3651_v41 = vld [vmem:[#allocation60_spill] sm:$0xff]  ;;  %v3652_v55 = vld [vmem:[#allocation62_spill] sm:$0xff] }
  0x85   : > { %v2976_v36 = vpack.c.bf16 %v632_v23, %v620_v22  ;;  %v680_v17 = vand.u32 4294901760, %v3649_v60  ;;  %1976 = vmatpush1.bf16.msra.mxu1 %v2925_v20  ;;  %v628_v26 = vand.u32 4294901760, %v627_v7  ;;  %v640_v62 = vand.u32 4294901760, %v639_v19  ;;  %v3650_v23 = vld [vmem:[#allocation59_spill] sm:$0xff] }
  0x86   : > { %2168 = vmatpush1.bf16.msra.mxu0 %v2913_v47  ;;  %v651_v48 = vsub.f32 %v3646_v27, %v650_v40  ;;  %v663_v46 = vsub.f32 %v3647_v51, %v662_v57  ;;  %1978 = vmatprep.subr.bf16.mxu1 %v1977_v6  ;;  %v2984_v58 = vpack.c.bf16 %v638_v39, %v626_v49  ;;  %v646_v33 = vand.u32 4294901760, %v645_v50  ;;  %v3653_v6 = vld [vmem:[#allocation63_spill] sm:$0xff] }
  0x87   : > { %2170 = vmatprep.subr.bf16.mxu0 %v2933_v12  ;;  %v658_v22 = vand.u32 4294901760, %v657_v15  ;;  %v674_v21 = vand.u32 4294901760, %v3650_v23  ;;  %v1989_v61 = vpack.c.bf16 %v634_v35, %v622_v52  ;;  %v669_v20 = vsub.f32 %v3648_v43, %v668_v42  ;;  %v3654_v12 = vld [vmem:[#allocation65_spill] sm:$0xff]  ;;  %v3655_v52 = vld [vmem:[#allocation66_spill] sm:$0xff] }
  0x88   : > { %v686_v47 = vand.u32 4294901760, %v3651_v41  ;;  %v692_v18 = vand.u32 4294901760, %v3652_v55  ;;  %v2990_v56 = vpack.c.bf16 %v656_v24, %v644_v34  ;;  %v681_v7 = vsub.f32 %v3649_v60, %v680_v17  ;;  %v3656_v60 = vld [vmem:[#allocation68_spill] sm:$0xff] }
  0x89   : > { %v704_v19 = vand.u32 4294901760, %v3653_v6  ;;  %v698_v49 = vand.u32 4294901760, %v3654_v12  ;;  %1980 = vmatpush1.bf16.msra.mxu1 %v1979_v37  ;;  %v1991_v39 = vpack.c.bf16 %v640_v62, %v628_v26  ;;  %v652_v50 = vand.u32 4294901760, %v651_v48 }
  0x8a   : > { %2172 = vmatpush1.bf16.msra.mxu0 %v2935_v32  ;;  %v664_v15 = vand.u32 4294901760, %v663_v46  ;;  %v710_v35 = vand.u32 4294901760, %v3655_v52  ;;  %1982 = vmatprep.subr.bf16.mxu1 %v1981_v1  ;;  %v1993_v43 = vpack.c.bf16 %v658_v22, %v646_v33  ;;  %v2998_v24 = vpack.c.bf16 %v662_v57, %v650_v40 }
  0x8b   : > { %2174 = vmatprep.subr.bf16.mxu0 %v2941_v5  ;;  %v675_v34 = vsub.f32 %v3650_v23, %v674_v21  ;;  %v716_v51 = vand.u32 4294901760, %v3656_v60  ;;  %v670_v27 = vand.u32 4294901760, %v669_v20  ;;  %v687_v37 = vsub.f32 %v3651_v41, %v686_v47  ;;  %v3657_v5 = vld [vmem:[#allocation69_spill] sm:$0xff]  ;;  %v3659_v41 = vld [vmem:[#allocation75_spill] sm:$0xff] }
  0x8c   : > { %v693_v32 = vsub.f32 %v3652_v55, %v692_v18  ;;  %v705_v26 = vsub.f32 %v3653_v6, %v704_v19  ;;  %v682_v62 = vand.u32 4294901760, %v681_v7  ;;  %v699_v48 = vsub.f32 %v3654_v12, %v698_v49 }
  0x8d   : > { %v711_v1 = vsub.f32 %v3655_v52, %v710_v35  ;;  %v728_v46 = vand.u32 4294901760, %v3657_v5  ;;  %1984 = vmatpush1.bf16.msra.mxu1 %v1983_v29  ;;  %v1995_v40 = vpack.c.bf16 %v664_v15, %v652_v50  ;;  %v3009_v57 = vpack.c.bf16 %v680_v17, %v668_v42  ;;  %v3658_v50 = vld [vmem:[#allocation74_spill] sm:$0xff] }
  0x8e   : > { %2176 = vmatpush1.bf16.msra.mxu0 %v2951_v11  ;;  %v722_v33 = vand.u32 4294901760, %v2741_v9  ;;  %v734_v22 = vand.u32 4294901760, %v2743_v28  ;;  %1986 = vmatprep.subr.bf16.mxu1 %v1985_v2  ;;  %v676_v20 = vand.u32 4294901760, %v675_v34  ;;  %v3014_v7 = vpack.c.bf16 %v686_v47, %v674_v21  ;;  %v3660_v21 = vld [vmem:[#allocation76_spill] sm:$0xff]  ;;  %v3661_v34 = vld [vmem:[#allocation78_spill] sm:$0xff] }
  0x8f   : > { %2178 = vmatprep.subr.bf16.mxu0 %v2958_v16  ;;  %v717_v52 = vsub.f32 %v3656_v60, %v716_v51  ;;  %v729_v12 = vsub.f32 %v3657_v5, %v728_v46  ;;  %v688_v29 = vand.u32 4294901760, %v687_v37  ;;  %v694_v6 = vand.u32 4294901760, %v693_v32 }
  0x90   : > { %v706_v11 = vand.u32 4294901760, %v705_v26  ;;  %v740_v17 = vand.u32 4294901760, %v3658_v50  ;;  %v1997_v42 = vpack.c.bf16 %v682_v62, %v670_v27  ;;  %v700_v15 = vand.u32 4294901760, %v699_v48 }
  0x91   : > { %v712_v55 = vand.u32 4294901760, %v711_v1  ;;  %v752_v23 = vand.u32 4294901760, %v3659_v41  ;;  %1988 = vmatpush1.bf16.msra.mxu1 %v1987_v31  ;;  %v723_v2 = vsub.f32 %v2741_v9, %v722_v33  ;;  %v735_v16 = vsub.f32 %v2743_v28, %v734_v22 }
  0x92   : > { %2180 = vmatpush1.bf16.msra.mxu0 %v2971_v30  ;;  %v746_v47 = vand.u32 4294901760, %v3660_v21  ;;  %v758_v37 = vand.u32 4294901760, %v3661_v34  ;;  %1990 = vmatprep.subr.bf16.mxu1 %v1989_v61  ;;  %v2193_v32 = vpack.c.bf16 %v704_v19, %v692_v18  ;;  %v718_v27 = vand.u32 4294901760, %v717_v52 }
  0x93   : > { %2182 = vmatprep.subr.bf16.mxu0 %v2976_v36  ;;  %v730_v26 = vand.u32 4294901760, %v729_v12  ;;  %v764_v62 = vand.u32 4294901760, %v2768_v8  ;;  %v1999_v48 = vpack.c.bf16 %v688_v29, %v676_v20  ;;  %v2001_v31 = vpack.c.bf16 %v706_v11, %v694_v6 }
  0x94   : > { %v3027_v1 = vpack.c.bf16 %v710_v35, %v698_v49  ;;  %v741_v30 = vsub.f32 %v3658_v50, %v740_v17  ;;  %v3030_v9 = vpack.c.bf16 %v712_v55, %v700_v15  ;;  %v3032_v28 = vpack.c.bf16 %v728_v46, %v716_v51  ;;  %v3662_v35 = vld [vmem:[#allocation83_spill] sm:$0xff]  ;;  %v3704_v50 = vld [vmem:[#allocation85_spill] sm:$0xff] }
  0x95   : > { %v753_v5 = vsub.f32 %v3659_v41, %v752_v23  ;;  %v776_v61 = vand.u32 4294901760, %v2770_v38  ;;  %1992 = vmatpush1.bf16.msra.mxu1 %v1991_v39  ;;  %v724_v36 = vand.u32 4294901760, %v723_v2  ;;  %v736_v18 = vand.u32 4294901760, %v735_v16  ;;  %v3664_v2 = vld [vmem:[#allocation88_spill] sm:$0xff] }
  0x96   : > { %2184 = vmatpush1.bf16.msra.mxu0 %v2984_v58  ;;  %v747_v19 = vsub.f32 %v3660_v21, %v746_v47  ;;  %v759_v6 = vsub.f32 %v3661_v34, %v758_v37  ;;  %1994 = vmatprep.subr.bf16.mxu1 %v1993_v43  ;;  %v2005_v55 = vpack.c.bf16 %v730_v26, %v718_v27  ;;  %v770_v49 = vand.u32 4294901760, %v2774_v14 }
  0x97   : > { %2186 = vmatprep.subr.bf16.mxu0 %v2990_v56  ;;  %v3040_v12 = vpack.c.bf16 %v734_v22, %v722_v33  ;;  %v765_v51 = vsub.f32 %v2768_v8, %v764_v62  ;;  %v742_v52 = vand.u32 4294901760, %v741_v30  ;;  %v777_v39 = vsub.f32 %v2770_v38, %v776_v61  ;;  %v3663_v56 = vld [vmem:[#allocation87_spill] sm:$0xff] }
  0x98   : > { %v782_v58 = vand.u32 4294901760, %v2776_v45  ;;  %v788_v46 = vand.u32 4294901760, %v3662_v35  ;;  %v754_v20 = vand.u32 4294901760, %v753_v5  ;;  %v3047_v29 = vpack.c.bf16 %v752_v23, %v740_v17  ;;  %v3665_v17 = vld [vmem:[#allocation89_spill] sm:$0xff] }
  0x99   : > { %v800_v43 = vand.u32 4294901760, %v2788_v54  ;;  %v794_v11 = vand.u32 4294901760, %v3663_v56  ;;  %1996 = vmatpush1.bf16.msra.mxu1 %v1995_v40  ;;  %v2007_v33 = vpack.c.bf16 %v736_v18, %v724_v36  ;;  %v748_v22 = vand.u32 4294901760, %v747_v19 }
  0x9a   : > { %2188 = vmatpush1.bf16.msra.mxu0 %v2998_v24  ;;  %v760_v15 = vand.u32 4294901760, %v759_v6  ;;  %v806_v16 = vand.u32 4294901760, %v3664_v2  ;;  %1998 = vmatprep.subr.bf16.mxu1 %v1997_v42  ;;  %v3054_v27 = vpack.c.bf16 %v758_v37, %v746_v47  ;;  %v766_v5 = vand.u32 4294901760, %v765_v51  ;;  %v3667_v51 = vld [vmem:[#allocation84_spill] sm:$0xff] }
  0x9b   : > { %2190 = vmatprep.subr.bf16.mxu0 %v3009_v57  ;;  %v771_v23 = vsub.f32 %v2774_v14, %v770_v49  ;;  %v812_v26 = vand.u32 4294901760, %v3665_v17  ;;  %v778_v30 = vand.u32 4294901760, %v777_v39  ;;  %v783_v40 = vsub.f32 %v2776_v45, %v782_v58  ;;  %v3666_v57 = vld [vmem:[#allocation91_spill] sm:$0xff] }
  0x9c   : > { %v789_v24 = vsub.f32 %v3662_v35, %v788_v46  ;;  %v801_v36 = vsub.f32 %v2788_v54, %v800_v43  ;;  %v2009_v18 = vpack.c.bf16 %v754_v20, %v742_v52  ;;  %v795_v19 = vsub.f32 %v3663_v56, %v794_v11 }
  0x9d   : > { %v807_v42 = vsub.f32 %v3664_v2, %v806_v16  ;;  %v824_v47 = vand.u32 4294901760, %v3666_v57  ;;  %2000 = vmatpush1.bf16.msra.mxu1 %v1999_v48  ;;  %v2011_v37 = vpack.c.bf16 %v760_v15, %v748_v22  ;;  %v3065_v6 = vpack.c.bf16 %v776_v61, %v764_v62  ;;  %v3668_v61 = vld [vmem:[#allocation49_spill] sm:$0xff] }
  0x9e   : > { %2192 = vmatpush1.bf16.msra.mxu0 %v3014_v7  ;;  %v230_v39 = vmul.f32 %v3667_v51, %v3667_v51  ;;  %2002 = vmatprep.subr.bf16.mxu1 %v2001_v31  ;;  %v772_v35 = vand.u32 4294901760, %v771_v23  ;;  %v3069_v54 = vpack.c.bf16 %v782_v58, %v770_v49  ;;  %v813_v52 = vsub.f32 %v3665_v17, %v812_v26  ;;  %v3669_v49 = vld [vmem:[#allocation94_spill] sm:$0xff] }
  0x9f   : > { %2194 = vmatprep.subr.bf16.mxu0 %v2193_v32  ;;  %v825_v20 = vsub.f32 %v3666_v57, %v824_v47  ;;  %v2013_v2 = vpack.c.bf16 %v778_v30, %v766_v5  ;;  %v784_v56 = vand.u32 4294901760, %v783_v40  ;;  %v790_v48 = vand.u32 4294901760, %v789_v24 }
  0xa0   : > { %v802_v45 = vand.u32 4294901760, %v801_v36  ;;  %v796_v7 = vand.u32 4294901760, %v795_v19  ;;  %v808_v22 = vand.u32 4294901760, %v807_v42  ;;  %v232_v62 = vcombine.high %v230_v39, %v230_v39 }
  0xa1   : > { %v239_v15 = vmul.f32 %v3667_v51, %v3668_v61  ;;  %2004 = vmatpush1.bf16.msra.mxu1 %v3030_v9  ;;  %v3077_v32 = vpack.c.bf16 %v800_v43, %v788_v46  ;;  %v818_v31 = vand.u32 4294901760, %v2817_v59  ;;  %v830_v58 = vand.u32 4294901760, %v3669_v49  ;;  %v3672_v51 = vld [vmem:[#allocation23_spill] sm:$0xff]  ;;  %v3677_v61 = vld [vmem:[#allocation30_spill] sm:$0xff] }
  0xa2   : > { %2196 = vmatpush1.bf16.msra.mxu0 %v3027_v1  ;;  %v233_v5 = vrot.slane %v230_v39, 7  ;;  %2006 = vmatprep.subr.bf16.mxu1 %v2005_v55  ;;  %v814_v23 = vand.u32 4294901760, %v813_v52  ;;  %v826_v30 = vand.u32 4294901760, %v825_v20  ;;  %v234_v40 = vrot.slane %v232_v62, 7  ;;  %v3673_v52 = vld [vmem:[#allocation25_spill] sm:$0xff]  ;;  %v3690_v20 = vld [vmem:[#allocation54_spill] sm:$0xff] }
  0xa3   : > { %2198 = vmatprep.subr.bf16.mxu0 %v3032_v28  ;;  %244 = vst [vmem:[#allocation2 + $0x18] sm:$0x70] %v239_v15  ;;  %v241_v24 = vcombine.low %v239_v15, %v239_v15  ;;  %v2015_v36 = vpack.c.bf16 %v784_v56, %v772_v35  ;;  %v3082_v19 = vpack.c.bf16 %v806_v16, %v794_v11  ;;  %v3531_v9 = vand.u32 4294901760, %v2835_v53  ;;  %v3670_v56 = vld [vmem:[#allocation20_spill] sm:$0xff]  ;;  %v3689_v11 = vld [vmem:[#allocation53_spill] sm:$0xff] }
  0xa4   : > { %v3530_v1 = vand.u32 4294901760, %v2838_v13  ;;  %237 = vst [vmem:[#allocation2 + $0x10] sm:$0xe] %v233_v5  ;;  %v2017_v46 = vpack.c.bf16 %v802_v45, %v790_v48  ;;  %v3086_v43 = vpack.c.bf16 %v808_v22, %v796_v7  ;;  %v3088_v42 = vpack.c.bf16 %v824_v47, %v812_v26  ;;  %238 = vst [vmem:[#allocation2 + $0x18] sm:$0xe] %v234_v40  ;;  %v3671_v47 = vld [vmem:[#allocation21_spill] sm:$0xff] }
  0xa5   : > { %243 = vst [vmem:[#allocation2 + $0x10] sm:$0x70] %v241_v24  ;;  %v3529_v28 = vand.u32 4294901760, %v2840_v10  ;;  %2008 = vmatpush1.bf16.msra.mxu1 %v2007_v33  ;;  %v819_v55 = vsub.f32 %v2817_v59, %v818_v31  ;;  %v831_v35 = vsub.f32 %v3669_v49, %v830_v58  ;;  %v2021_v45 = vpack.c.bf16 %v826_v30, %v814_v23  ;;  %v3675_v7 = vld [vmem:[#allocation28_spill] sm:$0xff]  ;;  %v3676_v22 = vld [vmem:[#allocation29_spill] sm:$0xff]  ;;  %v3700_v33 = vld [vmem:[#allocation71_spill] sm:$0xff] }
  0xa6   : > { %2200 = vmatpush1.bf16.msra.mxu0 %v3040_v12  ;;  %2010 = vmatprep.subr.bf16.mxu1 %v2009_v18  ;;  %v3097_v16 = vpack.c.bf16 %v830_v58, %v818_v31  ;;  %v3532_v26 = vand.u32 4294901760, %v2854_v3  ;;  %v837_v12 = vsub.f32 %v2835_v53, %v3531_v9  ;;  %v849_v39 = vsub.f32 %v2838_v13, %v3530_v1  ;;  %v3674_v18 = vld [vmem:[#allocation26_spill] sm:$0xff]  ;;  %v3678_v15 = vld [vmem:[#allocation32_spill] sm:$0xff]  ;;  %v3696_v58 = vld [vmem:[#allocation63_spill] sm:$0xff] }
  0xa7   : > { %2202 = vmatprep.subr.bf16.mxu0 %v3047_v29  ;;  %v3115_v48 = vsub.f32 %v2840_v10, %v3529_v28  ;;  %v820_v30 = vand.u32 4294901760, %v819_v55  ;;  %v832_v31 = vand.u32 4294901760, %v831_v35  ;;  %v3694_v35 = vld [vmem:[#allocation60_spill] sm:$0xff]  ;;  %v3697_v23 = vld [vmem:[#allocation65_spill] sm:$0xff]  ;;  %v3698_v29 = vld [vmem:[#allocation66_spill] sm:$0xff] }
  0xa8   : > { %v838_v28 = vand.u32 4294901760, %v837_v12  ;;  %v3701_v9 = vld [vmem:[#allocation72_spill] sm:$0xff]  ;;  %v3702_v12 = vld [vmem:[#allocation81_spill] sm:$0xff]  ;;  %v3705_v24 = vld [vmem:[#allocation87_spill] sm:$0xff] }
  0xa9   : > { %2012 = vmatpush1.bf16.msra.mxu1 %v2011_v37  ;;  %v855_v37 = vsub.f32 %v2854_v3, %v3532_v26  ;;  %v3703_v26 = vld [vmem:[#allocation83_spill] sm:$0xff]  ;;  %v2023_v41 = vpack.c.bf16 %v832_v31, %v820_v30  ;;  %v844_v21 = vand.u32 4294901760, %v3115_v48 }
  0xaa   : > { %2204 = vmatpush1.bf16.msra.mxu0 %v3054_v27  ;;  %2014 = vmatprep.subr.bf16.mxu1 %v2013_v2  ;;  %v3692_v2 = vld [vmem:[#allocation57_spill] sm:$0xff]  ;;  %v850_v27 = vand.u32 4294901760, %v849_v39 }
  0xab   : > { %2206 = vmatprep.subr.bf16.mxu0 %v3065_v6  ;;  %v248_v62 = vld [vmem:[#allocation2 + $0x18] sm:$0x7f]  ;;  %v856_v1 = vand.u32 4294901760, %v855_v37  ;;  %v3710_v37 = vand.u32 4294901760, %v2854_v3 }
  0xac   : > { %v247_v40 = vld [vmem:[#allocation2 + $0x10] sm:$0x7f]  ;;  %v3146_v5 = vand.u32 4294901760, %v248_v62 }
  0xad   : > { %v3693_v6 = vld [vmem:[#allocation59_spill] sm:$0xff]  ;;  %v3148_v55 = vand.u32 4294901760, %v247_v40  ;;  %2016 = vmatpush1.bf16.msra.mxu1 %v2015_v36 }
  0xae   : > { %2208 = vmatpush1.bf16.msra.mxu0 %v3069_v54  ;;  %2018 = vmatprep.subr.bf16.mxu1 %v2017_v46  ;;  %v3163_v4 = vsub.f32 %v248_v62, %v3146_v5  ;;  %v3706_v46 = vld [vmem:[#allocation88_spill] sm:$0xff]  ;;  %v2089_v54 = vpack.c.bf16 %v2838_v13, %v2835_v53 }
  0xaf   : > { %2210 = vmatprep.subr.bf16.mxu0 %v3077_v32  ;;  %v3166_v36 = vsub.f32 %v247_v40, %v3148_v55  ;;  %v2025_v40 = vpack.c.bf16 %v850_v27, %v838_v28  ;;  %v3711_v27 = vld [vmem:[#allocation12_spill] sm:$0xff] }
  0xb0   : > { %v459_v39 = vand.u32 4294901760, %v3163_v4 }
  0xb1   : > { %v465_v62 = vand.u32 4294901760, %v3166_v36  ;;  %2020 = vmatpush1.bf16.msra.mxu1 %v3086_v43  ;;  %v3707_v43 = vand.u32 4294901760, %v2835_v53 }
  0xb2   : > { %2212 = vmatpush1.bf16.msra.mxu0 %v3082_v19  ;;  %2022 = vmatprep.subr.bf16.mxu1 %v2021_v45  ;;  %v460_v17 = vsub.f32 %v3163_v4, %v459_v39  ;;  %v3708_v19 = vand.u32 4294901760, %v2838_v13  ;;  %v2027_v45 = vpack.c.bf16 %v856_v1, %v844_v21  ;;  %v3717_v1 = vld [vmem:[#allocation18_spill] sm:$0xff] }
  0xb3   : > { %2214 = vmatprep.subr.bf16.mxu0 %v3088_v42  ;;  %v466_v59 = vsub.f32 %v3166_v36, %v465_v62  ;;  %1231 = vmatprep.mubr.f32.mxu0 %v459_v39  ;;  %v3709_v42 = vand.u32 4294901760, %v2840_v10  ;;  %v3712_v39 = vld [vmem:[#allocation14_spill] sm:$0xff] }
  0xb4   : > { %v2217_v31 = vpack.c.bf16 %v3708_v19, %v3707_v43  ;;  %v461_v30 = vand.u32 4294901760, %v460_v17  ;;  %1235 = vmatmul.mubr.f32.gmra.mrb[2].mxu0 %v465_v62  ;;  %v2029_v32 = vpack.c.bf16 %v3712_v39, %v3711_v27  ;;  %v3713_v43 = vld [vmem:[#allocation98_spill] sm:$0xff]  ;;  %v3716_v17 = vld [vmem:[#allocation9_spill] sm:$0xff]  ;;  %v3733_v27 = vpack.c.bf16 %v3678_v15, %v3677_v61  ;;  %v3746_v61 = vld [vmem:[#allocation40_spill] sm:$0xff] }
  0xb5   : > { %v467_v48 = vand.u32 4294901760, %v466_v59  ;;  %2024 = vmatpush1.bf16.msra.mxu1 %v2023_v41  ;;  %v2219_v28 = vpack.c.bf16 %v3710_v37, %v3709_v42  ;;  %1498 = vmatprep.mubr.f32.mxu0 %v3713_v43  ;;  %v3714_v59 = vld [vmem:[#allocation15_spill] sm:$0xff]  ;;  %v3715_v41 = vld [vmem:[#allocation16_spill] sm:$0xff]  ;;  %v3720_v19 = vld [vmem:[#allocation10_spill] sm:$0xff]  ;;  %v3727_v37 = vpack.c.bf16 %v3674_v18, %v3673_v52 }
  0xb6   : > { %2216 = vmatpush1.bf16.msra.mxu0 %v3097_v16  ;;  %462 = vmatprep.mubr.f32.mxu1 %v461_v30  ;;  %v2031_v21 = vpack.c.bf16 %v3715_v41, %v3714_v59  ;;  %v3718_v16 = vld [vmem:[#allocation19_spill] sm:$0xff]  ;;  %v3723_v30 = vld [vmem:[#allocation13_spill] sm:$0xff]  ;;  %v3726_v42 = vld [vmem:[#allocation100_spill] sm:$0xff] }
  0xb7   : > { %2026 = vmatprep.subr.bf16.mxu1 %v2025_v40  ;;  %2218 = vmatprep.subr.bf16.mxu0 %v2217_v31  ;;  %v2033_v62 = vpack.c.bf16 %v3718_v16, %v3717_v1  ;;  %v3719_v40 = vld [vmem:[#allocation97_spill] sm:$0xff]  ;;  %v3721_v31 = vld [vmem:[#allocation11_spill] sm:$0xff]  ;;  %v3736_v39 = vld [vmem:[#allocation34_spill] sm:$0xff] }
  0xb8   : > { %468 = vmatmul.mubr.f32.gmra.mrb[2].mxu1 %v467_v48  ;;  %v3724_v48 = vpack.c.bf16 %v3672_v51, %v3671_v47  ;;  %v3731_v47 = vpack.c.bf16 %v3676_v22, %v3675_v7  ;;  %v3732_v51 = vld [vmem:[#allocation27_spill] sm:$0xff]  ;;  %v3740_v59 = vld [vmem:[#allocation36_spill] sm:$0xff]  ;;  %v3742_v7 = vld [vmem:[#allocation37_spill] sm:$0xff] }
  0xb9   : > { %859 = vmatprep.mubr.f32.mxu1 %v3713_v43  ;;  %2028 = vmatpush1.bf16.msra.mxu1 %v2027_v45  ;;  %v3725_v45 = vld [vmem:[#allocation17_spill] sm:$0xff]  ;;  %v3734_v52 = vld [vmem:[#allocation31_spill] sm:$0xff]  ;;  %v3747_v15 = vld [vmem:[#allocation44_spill] sm:$0xff] }
  0xba   : > { %2220 = vmatpush1.bf16.msra.mxu0 %v2219_v28  ;;  %2030 = vmatprep.subr.bf16.mxu1 %v2029_v32  ;;  %v3722_v32 = vpack.c.bf16 %v2599_v44, %v3670_v56  ;;  %v3728_v28 = vld [vmem:[#allocation22_spill] sm:$0xff]  ;;  %v3729_v44 = vpack.c.bf16 %v2624_v0, %v2622_v63  ;;  %v3730_v56 = vld [vmem:[#allocation24_spill] sm:$0xff]  ;;  %v3735_v18 = vld [vmem:[#allocation35_spill] sm:$0xff] }
  0xbb   : > { %2222 = vmatprep.subr.bf16.mxu0 %v3716_v17  ;;  %v3738_v63 = vld [vmem:[#allocation33_spill] sm:$0xff]  ;;  %v3739_v0 = vld [vmem:[#allocation38_spill] sm:$0xff]  ;;  %v3748_v1 = vld [vmem:[#allocation43_spill] sm:$0xff] }
  0xbc   : > { %861 = vmatmul.mubr.f32.vlgmr.msra.gmra.mrb[0].mxu1 %v3719_v40  ;;  %v3741_v41 = vpack.c.bf16 %v3739_v0, %v3740_v59  ;;  %v3743_v22 = vld [vmem:[#allocation41_spill] sm:$0xff]  ;;  %v3749_v16 = vpack.c.bf16 %v3747_v15, %v3748_v1  ;;  %v3776_v0 = vld [vmem:[#allocation74_spill] sm:$0xff] }
  0xbd   : > { %1500 = vmatmul.mubr.f32.vlgmr.msra.gmra.mrb[0].mxu0 %v3719_v40  ;;  %2032 = vmatpush1.bf16.msra.mxu1 %v2031_v21  ;;  %v3744_v21 = vld [vmem:[#allocation39_spill] sm:$0xff] }
  0xbe   : > { %2224 = vmatpush1.bf16.msra.mxu0 %v3720_v19  ;;  %2034 = vmatprep.subr.bf16.mxu1 %v2033_v62  ;;  %v3745_v17 = vpack.c.bf16 %v3743_v22, %v3744_v21  ;;  %v3750_v62 = vld [vmem:[#allocation42_spill] sm:$0xff]  ;;  %v3751_v19 = vld [vmem:[#allocation47_spill] sm:$0xff]  ;;  %v3786_v22 = vpack.c.bf16 %v3704_v50, %v3703_v26  ;;  %v3788_v21 = vpack.c.bf16 %v3706_v46, %v3705_v24  ;;  %v3795_v50 = vld [vmem:[#allocation92_spill] sm:$0xff] }
  0xbf   : > { %2226 = vmatprep.subr.bf16.mxu0 %v3721_v31  ;;  %867 = vmatprep.mubr.f32.mxu1 %v3146_v5  ;;  %v3752_v31 = vld [vmem:[#allocation46_spill] sm:$0xff]  ;;  %v3796_v26 = vld [vmem:[#allocation95_spill] sm:$0xff]  ;;  %v3797_v24 = vpack.c.bf16 %v2854_v3, %v2840_v10 }
  0xc0   : > { %1506 = vmatprep.mubr.f32.mxu0 %v3146_v5  ;;  %869 = vmatmul.mubr.f32.gmra.mrb[2].mxu1 %v3148_v55  ;;  %v3799_v46 = vld [vmem:[#allocation99_spill] sm:$0xff] }
  0xc1   : > { %1508 = vmatmul.mubr.f32.gmra.mrb[2].mxu0 %v3148_v55  ;;  %2036 = vmatpush1.bf16.msra.mxu1 %v3722_v32  ;;  %v3753_v32 = vpack.c.bf16 %v3751_v19, %v3752_v31 }
  0xc2   : > { %2228 = vmatpush1.bf16.msra.mxu0 %v3723_v30  ;;  %2038 = vmatprep.subr.bf16.mxu1 %v3724_v48  ;;  %v3754_v30 = vld [vmem:[#allocation45_spill] sm:$0xff]  ;;  %v3755_v48 = vld [vmem:[#allocation51_spill] sm:$0xff] }
  0xc3   : > { %2230 = vmatprep.subr.bf16.mxu0 %v3725_v45  ;;  %1069 = vmatprep.mubr.f32.mxu1 %v3726_v42  ;;  %v3756_v45 = vld [vmem:[#allocation48_spill] sm:$0xff] }
  0xc4   : > { %1643 = vmatprep.mubr.f32.mxu0 %v3713_v43  ;;  %v3737_v43 = vpack.c.bf16 %v3735_v18, %v3736_v39  ;;  %v3757_v42 = vpack.c.bf16 %v3755_v48, %v3756_v45  ;;  %v3766_v18 = vld [vmem:[#allocation62_spill] sm:$0xff] }
  0xc5   : > { %2040 = vmatpush1.bf16.msra.mxu1 %v3727_v37  ;;  %v3758_v37 = vld [vmem:[#allocation50_spill] sm:$0xff]  ;;  %v3767_v39 = vpack.c.bf16 %v3696_v58, %v3766_v18 }
  0xc6   : > { %2232 = vmatpush1.bf16.msra.mxu0 %v3728_v28  ;;  %2042 = vmatprep.subr.bf16.mxu1 %v3729_v44  ;;  %v3759_v28 = vpack.c.bf16 %v3690_v20, %v3689_v11  ;;  %v3760_v44 = vld [vmem:[#allocation52_spill] sm:$0xff]  ;;  %v3768_v11 = vld [vmem:[#allocation61_spill] sm:$0xff]  ;;  %v3769_v20 = vpack.c.bf16 %v3698_v29, %v3697_v23  ;;  %v3774_v58 = vld [vmem:[#allocation70_spill] sm:$0xff] }
  0xc7   : > { %2234 = vmatprep.subr.bf16.mxu0 %v3730_v56  ;;  %v3761_v56 = vld [vmem:[#allocation56_spill] sm:$0xff]  ;;  %v3778_v29 = vld [vmem:[#allocation73_spill] sm:$0xff] }
  0xc8   : > { %v3779_v23 = vld [vmem:[#allocation76_spill] sm:$0xff] }
  0xc9   : > { %2044 = vmatpush1.bf16.msra.mxu1 %v3731_v47  ;;  %v3762_v47 = vpack.c.bf16 %v3692_v2, %v3761_v56  ;;  %v3770_v2 = vld [vmem:[#allocation64_spill] sm:$0xff] }
  0xca   : > { %2236 = vmatpush1.bf16.msra.mxu0 %v3732_v51  ;;  %2046 = vmatprep.subr.bf16.mxu1 %v3733_v27  ;;  %v3763_v51 = vld [vmem:[#allocation55_spill] sm:$0xff]  ;;  %v3764_v27 = vpack.c.bf16 %v3694_v35, %v3693_v6  ;;  %v3773_v35 = vpack.c.bf16 %v3701_v9, %v3700_v33  ;;  %v3784_v33 = vpack.c.bf16 %v3702_v12, %v2774_v14  ;;  %v3792_v14 = vld [vmem:[#allocation90_spill] sm:$0xff]  ;;  %v3793_v12 = vld [vmem:[#allocation93_spill] sm:$0xff] }
  0xcb   : > { %2238 = vmatprep.subr.bf16.mxu0 %v3734_v52  ;;  %v3765_v52 = vld [vmem:[#allocation58_spill] sm:$0xff]  ;;  %v3772_v6 = vld [vmem:[#allocation67_spill] sm:$0xff] }
  0xcc   : > { %v3783_v9 = vld [vmem:[#allocation79_spill] sm:$0xff] }
  0xcd   : > { %2048 = vmatpush1.bf16.msra.mxu1 %v3737_v43  ;;  %v3771_v43 = vpack.c.bf16 %v3699_v25, %v3656_v60  ;;  %v3781_v25 = vld [vmem:[#allocation77_spill] sm:$0xff]  ;;  %v3782_v60 = vpack.c.bf16 %v2770_v38, %v2768_v8  ;;  %v3789_v8 = vld [vmem:[#allocation86_spill] sm:$0xff] }
  0xce   : > { %2240 = vmatpush1.bf16.msra.mxu0 %v3738_v63  ;;  %2050 = vmatprep.subr.bf16.mxu1 %v3741_v41  ;;  %v3775_v63 = vld [vmem:[#allocation75_spill] sm:$0xff]  ;;  %v3780_v41 = vpack.c.bf16 %v3661_v34, %v3779_v23  ;;  %v3787_v34 = vld [vmem:[#allocation82_spill] sm:$0xff]  ;;  %v3790_v38 = vld [vmem:[#allocation89_spill] sm:$0xff] }
  0xcf   : > { %2242 = vmatprep.subr.bf16.mxu0 %v3742_v7  ;;  %v3777_v59 = vpack.c.bf16 %v3775_v63, %v3776_v0  ;;  %v3785_v7 = vld [vmem:[#allocation80_spill] sm:$0xff] }
  0xd1   : > { %2052 = vmatpush1.bf16.msra.mxu1 %v3745_v17  ;;  %v3791_v17 = vpack.c.bf16 %v3666_v57, %v3790_v38  ;;  %v3798_v57 = vld [vmem:[#allocation96_spill] sm:$0xff] }
  0xd2   : > { %2244 = vmatpush1.bf16.msra.mxu0 %v3746_v61  ;;  %2054 = vmatprep.subr.bf16.mxu1 %v3749_v16  ;;  %v3794_v61 = vpack.c.bf16 %v3669_v49, %v3793_v12 }
  0xd3   : > { %2246 = vmatprep.subr.bf16.mxu0 %v3750_v62 }
  0xd5   : > { %2056 = vmatpush1.bf16.msra.mxu1 %v3753_v32 }
  0xd6   : > { %2248 = vmatpush1.bf16.msra.mxu0 %v3754_v30  ;;  %2058 = vmatprep.subr.bf16.mxu1 %v3757_v42 }
  0xd7   : > { %2250 = vmatprep.subr.bf16.mxu0 %v3758_v37 }
  0xd9   : > { %2060 = vmatpush1.bf16.msra.mxu1 %v3759_v28 }
  0xda   : > { %2252 = vmatpush1.bf16.msra.mxu0 %v3760_v44  ;;  %2062 = vmatprep.subr.bf16.mxu1 %v3762_v47 }
  0xdb   : > { %2254 = vmatprep.subr.bf16.mxu0 %v3763_v51 }
  0xdd   : > { %2064 = vmatpush1.bf16.msra.mxu1 %v3764_v27 }
  0xde   : > { %2256 = vmatpush1.bf16.msra.mxu0 %v3765_v52  ;;  %2066 = vmatprep.subr.bf16.mxu1 %v3767_v39 }
  0xdf   : > { %2258 = vmatprep.subr.bf16.mxu0 %v3768_v11 }
  0xe1   : > { %2068 = vmatpush1.bf16.msra.mxu1 %v3769_v20 }
  0xe2   : > { %2260 = vmatpush1.bf16.msra.mxu0 %v3770_v2  ;;  %2070 = vmatprep.subr.bf16.mxu1 %v3771_v43 }
  0xe3   : > { %2262 = vmatprep.subr.bf16.mxu0 %v3772_v6 }
  0xe5   : > { %2072 = vmatpush1.bf16.msra.mxu1 %v3773_v35 }
  0xe6   : > { %2264 = vmatpush1.bf16.msra.mxu0 %v3774_v58  ;;  %2074 = vmatprep.subr.bf16.mxu1 %v3777_v59 }
  0xe7   : > { %2266 = vmatprep.subr.bf16.mxu0 %v3778_v29 }
  0xe9   : > { %2076 = vmatpush1.bf16.msra.mxu1 %v3780_v41 }
  0xea   : > { %2268 = vmatpush1.bf16.msra.mxu0 %v3781_v25  ;;  %2078 = vmatprep.subr.bf16.mxu1 %v3782_v60 }
  0xeb   : > { %2270 = vmatprep.subr.bf16.mxu0 %v3783_v9 }
  0xed   : > { %2080 = vmatpush1.bf16.msra.mxu1 %v3784_v33 }
  0xee   : > { %2272 = vmatpush1.bf16.msra.mxu0 %v3785_v7  ;;  %2082 = vmatprep.subr.bf16.mxu1 %v3786_v22 }
  0xef   : > { %2274 = vmatprep.subr.bf16.mxu0 %v3787_v34 }
  0xf1   : > { %2084 = vmatpush1.bf16.msra.mxu1 %v3788_v21 }
  0xf2   : > { %2276 = vmatpush1.bf16.msra.mxu0 %v3789_v8  ;;  %2086 = vmatprep.subr.bf16.mxu1 %v3791_v17 }
  0xf3   : > { %2278 = vmatprep.subr.bf16.mxu0 %v3792_v14 }
  0xf5   : > { %2088 = vmatpush1.bf16.msra.mxu1 %v3794_v61 }
  0xf6   : > { %2280 = vmatpush1.bf16.msra.mxu0 %v3795_v50  ;;  %2090 = vmatprep.subr.bf16.mxu1 %v2089_v54 }
  0xf7   : > { %2282 = vmatprep.subr.bf16.mxu0 %v3796_v26 }
  0xf9   : > { %2092 = vmatpush1.bf16.msra.mxu1 %v3797_v24 }
  0xfa   : > { %2284 = vmatpush1.bf16.msra.mxu0 %v3798_v57 }
  0xfc   : > { %1072 = vmatmul.mubr.f32.vlgmr.msra.gmra.mrb[0].mxu1 %v3799_v46 }
  0xfd   : > { %1645 = vmatmul.mubr.f32.vlgmr.msra.gmra.mrb[0].mxu0 %v3719_v40  ;;  %1079 = vmatprep.mubr.f32.mxu1 %v3163_v4 }
  0xfe   : > { %1651 = vmatprep.mubr.f32.mxu0 %v3146_v5 }
 0x100   : > { %1082 = vmatmul.mubr.f32.gmra.mrb[2].mxu1 %v3166_v36 }
 0x101   : > { %1653 = vmatmul.mubr.f32.gmra.mrb[2].mxu0 %v3148_v55 }
 0x1cf   : > { %v1073_v13 = vpop.f32.mrb[0].mxu1 }
 0x1d0   : > { %v1646_v53 = vpop.f32.mrb[0].mxu0  ;;  %v1075_v54 = vpop.f32.mrb[1].mxu1 }
 0x1d1   : > { %v2285_v49 = vadd.f32 %v1646_v53, %v1073_v13  ;;  %v1648_v10 = vpop.f32.mrb[1].mxu0 }
 0x1d2   : > { %v2286_v3 = vadd.f32 %v1648_v10, %v1075_v54 }
 0x1d3   : > { %v1659_v15 = vmul.f32 %v2285_v49, %v2285_v49  ;;  %v1663_v1 = vrot.slane %v2285_v49, 3  ;;  %v1083_v62 = vpop.f32.mrb[2].mxu1 }
 0x1d4   : > { %v1660_v16 = vmul.f32 %v2286_v3, %v2286_v3  ;;  %v1654_v19 = vpop.f32.mrb[2].mxu0  ;;  %v1664_v40 = vrot.slane %v2286_v3, 3  ;;  %v1085_v5 = vpop.f32.mrb[3].mxu1 }
 0x1d5   : > { %v2287_v31 = vadd.f32 %v1654_v19, %v1083_v62  ;;  %v1667_v4 = vmul.f32 %v2285_v49, %v1663_v1  ;;  %v1671_v32 = vrot.slane %v1659_v15, 2  ;;  %v1656_v30 = vpop.f32.mrb[3].mxu0  ;;  %v1717_v37 = vrot.slane %v1659_v15, 3 }
 0x1d6   : > { %v2288_v36 = vadd.f32 %v1656_v30, %v1085_v5  ;;  %v1668_v48 = vmul.f32 %v2286_v3, %v1664_v40  ;;  %v1672_v55 = vrot.slane %v1660_v16, 2  ;;  %v1718_v28 = vrot.slane %v1660_v16, 3 }
 0x1d7   : > { %v1677_v45 = vsub.f32 %v2287_v31, %v1671_v32  ;;  %v1681_v42 = vrot.slane %v1667_v4, 4  ;;  %v1675_v56 = vsub.f32 %v2285_v49, %v1671_v32  ;;  %v1705_v52 = vmul.f32 2.0, %v1667_v4 }
 0x1d8   : > { %v1678_v44 = vsub.f32 %v2288_v36, %v1672_v55  ;;  %v1682_v27 = vrot.slane %v1668_v48, 4  ;;  %v1676_v18 = vsub.f32 %v2286_v3, %v1672_v55  ;;  %v1721_v6 = vadd.f32 %v1717_v37, %v1659_v15 }
 0x1d9   : > { %v1685_v47 = vsub.f32 %v2287_v31, %v1681_v42  ;;  %v1693_v51 = vrot.slane %v1677_v45, 3  ;;  %v1722_v63 = vadd.f32 %v1718_v28, %v1660_v16  ;;  %v1706_v60 = vmul.f32 2.0, %v1668_v48 }
 0x1da   : > { %v1694_v39 = vrot.slane %v1678_v44, 3  ;;  %v1686_v43 = vsub.f32 %v2288_v36, %v1682_v27  ;;  %v1707_v9 = vadd.f32 0.0001, %v1705_v52  ;;  %v1723_v34 = vadd.f32 0.0001, %v1721_v6 }
 0x1db   : > { %v1687_v11 = vmul.f32 2.0, %v1685_v47  ;;  %v1697_v20 = vadd.f32 %v1693_v51, %v1675_v56  ;;  %v1699_v2 = vadd.f32 %v1693_v51, %v1677_v45  ;;  %v1724_v12 = vadd.f32 0.0001, %v1722_v63 }
 0x1dc   : > { %v1698_v35 = vadd.f32 %v1694_v39, %v1676_v18  ;;  %v1700_v58 = vadd.f32 %v1694_v39, %v1678_v44  ;;  %v1688_v23 = vmul.f32 2.0, %v1686_v43  ;;  %v1708_v50 = vadd.f32 0.0001, %v1706_v60 }
 0x1dd   : > { %v1689_v0 = vadd.f32 0.0009, %v1687_v11  ;;  %v1701_v59 = vadd.f32 0.0009, %v1697_v20  ;;  %v1703_v29 = vadd.f32 0.0009, %v1699_v2  ;;  %v1767_v32 = vlaneseq }
 0x1de   : > { %v1702_v41 = vadd.f32 0.0009, %v1698_v35  ;;  %v1704_v25 = vadd.f32 0.0009, %v1700_v58  ;;  %v1690_v21 = vadd.f32 0.0009, %v1688_v23 }
 0x1df   : > { %v1711_v33 = vrot.slane %v1689_v0, 4  ;;  %v1730_v7 = vrot.slane %v1701_v59, 6  ;;  %v1731_v22 = vrot.slane %v1703_v29, 6  ;;  %v2463_v31 = vmov 1966171168  }
 0x1e0   : > { %v1733_v8 = vrot.slane %v1702_v41, 6  ;;  %v1734_v38 = vrot.slane %v1704_v25, 6  ;;  %v1712_v26 = vrot.slane %v1690_v21, 4  ;;  %v1765_v4 = vunpack.c.l.s4 %v2463_v31 }
 0x1e1   : > { %v1715_v17 = vmul.f32 %v1711_v33, %v1707_v9  ;;  %v1732_v14 = vsel %vm1729_vm0, %v1730_v7, %v1731_v22  ;;  %v1768_v45 = vshrl.u32 %v1767_v32, 7  ;;  %vm1781_vm2 = vcmp.lt.s32.totalorder %v1767_v32, 256 }
 0x1e2   : > { %v1738_v61 = vmul.f32 %v1732_v14, %v1723_v34  ;;  %v1735_v24 = vsel %vm1729_vm0, %v1733_v8, %v1734_v38  ;;  %v1716_v46 = vmul.f32 %v1712_v26, %v1708_v50  ;;  %v1766_v55 = vunpack.c.0.s8 %v1765_v4 }
 0x1e3   : > { %v1739_v57 = vmul.f32 %v1735_v24, %v1724_v12 }
 0x1e4   : > { %2360 = vrcp.f32 %v1738_v61  ;;  %v1769_v56 = vsub.s32 %v1766_v55, %v1768_v45 }
 0x1e5   : > { %2362 = vrcp.f32 %v1739_v57 }
 0x1ee   : > { %v2361_v13 = vpop.eup %2360 }
 0x1ef   : > { %v2363_v53 = vpop.eup %2362  ;;  %v1742_v49 = vmul.f32 %v2361_v13, %v1715_v17 }
 0x1f0   : > { %v1743_v54 = vmul.f32 %v2363_v53, %v1716_v46 }
 0x1f1   : > { %v1745_v10 = vsel %vm1744_vm1, %v1742_v49, 0.0 }
 0x1f2   : > { %v1746_v3 = vrot.slane %v1745_v10, 4  ;;  %v1752_v15 = vsel %vm1744_vm1, %v1743_v54, 0.0 }
 0x1f3   : > { %v1753_v1 = vrot.slane %v1752_v15, 4 }
 0x1f4   : > { %v1747_v16 = vadd.f32 %v1746_v3, %v1745_v10 }
 0x1f5   : > { %v1754_v62 = vadd.f32 %v1753_v1, %v1752_v15 }
 0x1f6   : > { %v1748_v19 = vrot.slane %v1747_v16, 2 }
 0x1f7   : > { %v1755_v40 = vrot.slane %v1754_v62, 2 }
 0x1f8   : > { %v1749_v5 = vadd.f32 %v1748_v19, %v1747_v16 }
 0x1f9   : > { %v1756_v30 = vadd.f32 %v1755_v40, %v1754_v62 }
 0x1fa   : > { %v1750_v36 = vrot.slane %v1749_v5, 1 }
 0x1fb   : > { %v1757_v48 = vrot.slane %v1756_v30, 1 }
 0x1fc   : > { %v1751_v42 = vadd.f32 %v1750_v36, %v1749_v5 }
 0x1fd   : > { %v1758_v37 = vadd.f32 %v1757_v48, %v1756_v30 }
 0x1fe   : > { %v1759_v28 = vmul.f32 0.33333334, %v1751_v42 }
 0x1ff   : > { %v1760_v44 = vmul.f32 0.33333334, %v1758_v37 }
 0x201   : > { %v1763_v47 = vcombine.low %v1759_v28, %v1760_v44 }
 0x203   : > { %v1770_v51 = vrot.slane %v1763_v47, %v1769_v56 }
 0x205   : > { %v1777_v27 = vrot.slane %v1770_v51, %v1769_v56 }
 0x207   : > { %1783 = vst.msk [vmem:[%s193_s6] sm:$0x3] %vm1781_vm2, %v1777_v27 }
 0x208   : > { %2405 = shalt.err (!%p2402_p7)
}
 0x209   : > { %s2406_s24 = scalar_lea.hbm %s3349_s10, 32  ;;  %s2410_s27 = scalar_lea.hbm %s3394_s3, 64 }
 0x20a   : > { %p2407_p8 = scmp.ne.s32.totalorder %s3349_s10, %s2406_s24  ;;  %p2411_p1 = scmp.lt.u32.totalorder %s3349_s10, %s3394_s3 }
 0x20b   : > { %p2412_p0 = scmp.lt.u32.totalorder %s2410_s27, %s2406_s24  ;;  %p2414_p6 = scmp.lt.u32.totalorder %s2406_s24, %s3349_s10 }
 0x20c   : > { %p2408_p11 = pnand %p2407_p8, %p3800_p9 }
 0x20d   : > { %p2413_p5 = por %p2412_p0, %p2411_p1 }
 0x20e   : > { %p2409_p13 = pneg %p2408_p11 }
 0x20f   : > { %p2415_p10 = por %p2414_p6, %p2413_p5 }
 0x211   : > { %p2416_p12 = pnand %p2415_p10, %p2409_p13 }
 0x213   : > { %2419 = shalt.err (!%p2416_p12)
}
 0x214   : > { %2309 = dma.vmem_to_hbm [thread:$0]  (%p3800_p9), %s3351_s7, 32, %s3349_s10, %s1785_s11  }
 0x215 PF: > { %p2321_p2 = scmp.ge.s32.totalorder %s2458_s15, 2  ;;  %s1811_s30 = sand.u32 1, %s2446_s12  }
 0x216   : > { %p3801_p3 = scmp.ne.s32.totalorder %s3541_s23, 0  ;;  %s1812_s4 = scalar_lea.sflag [#allocation5], %s1811_s30 }
 0x218   : > { %p2316_p4 = pnand %p2321_p2, %p3801_p3 }
 0x21a   : > { %2441 = dma.done.wait (!%p2316_p4), %s1812_s4, 32  }
 0x21b   : > { %2443 = vsyncadd (!%p2316_p4), %s1812_s4, 4294967264  ;;  %p14_p7 = scmp.ge.s32.totalorder %s2510_s18, 4   ;;  %s3802_s12 = smov %s2450_s13 }
 0x21c   : > { %s3803_s13 = smov %s2454_s14  ;;  %s3804_s14 = smov %s2521_s21 }
 0x21d   : > { %s3805_s15 = smov %s2510_s18  ;;  %16 = sbr.rel (!%p14_p7) target bundleno = 4 (0x4), region = 75 }
 0x224   :  { %1817 = vsyncpa [#allocation4], 1 }
 0x225   :  { %1819 = vsyncpa [#allocation4 + $0x1], 1 }
 0x226   :  { %1820 = vsyncpa [#allocation5], 1 }
 0x227   :  { %1822 = vsyncpa [#allocation5 + $0x1], 1 }

</bundles_post_ra>
